<compile_context>
chip_gen: v5e
topology: v5e:2x2
jax: 0.10.0
libtpu: 0.0.40
codegen_flags: <defaults>
</compile_context>

<pallas_src>
import math

import numpy as np
import jax
import jax.numpy as jnp
from jax.experimental import pallas as pl
from jax.experimental.pallas import tpu as pltpu


# ----------------------------- model config (small) -----------------------------
SEQ_LEN = 16
PATCH_SIZE = 4
CHANNELS = 3
NUM_CLASSES = 10
DIM = 32
DEPTH = 2
HEADS = 4
DIM_HEAD = 8
MLP_DIM = 64
BATCH = 2

NUM_PATCHES = SEQ_LEN // PATCH_SIZE          # 4
PATCH_DIM = PATCH_SIZE * 5 * CHANNELS        # 60
INNER_DIM = HEADS * DIM_HEAD                 # 32
N_TOK = NUM_PATCHES + 1                      # 5
LN_EPS = 1e-5
MASK_VALUE = -1e30                           # large-but-finite self/cross-batch mask

BN = BATCH * N_TOK                           # 10  query rows
BP = BATCH * NUM_PATCHES                     # 8   patch rows
HN = HEADS * N_TOK                           # 20
BHN = BATCH * HN                             # 40  block-diagonal K/V rows

# ---- packed constant slab layout (one DMA for all constant matrices) ----
AGG_R0 = 0            # (BHN, BHN) per-(batch,head) block summation
AB_R0 = 40            # (BN, BHN) additive attention bias (0 / MASK_VALUE)
REP_R0 = 56           # (BHN, BN) replicate k/v rows into block-diag layout
CLS_R0 = 96           # (8, BN)   gather cls rows (padded to 8 rows)
SEL_R0 = 104          # (BN, BP)  scatter patch tokens into token rows
CONST_ROWS = 120
CONST_COLS = 40

# ---- packed misc slab layout ----
HG_ROW = BN           # 10: head LayerNorm gamma
HB_ROW = BN + 1       # 11: head LayerNorm beta
HMASK_R0 = 16         # 16..55: (BHN, DIM) head-column mask for K_bd/V_bd
MISC_ROWS = HMASK_R0 + BHN   # 56

HEAD_PAD = 128        # lane-dense logits width
OUT_ROWS = 8          # lane-dense logits rows (>= BATCH, sublane aligned)


# ----------------------------- host-built constants -----------------------------
def _build_const_np():
    c = np.zeros((CONST_ROWS, CONST_COLS), np.float32)
    # block aggregation: same (batch, head) block -> 1
    for a in range(BHN):
        for b in range(BHN):
            if a // N_TOK == b // N_TOK:
                c[AGG_R0 + a, b] = 1.0
    # additive attention bias: cross-batch or self -> MASK_VALUE
    for b in range(BATCH):
        for i in range(N_TOK):
            row = b * N_TOK + i
            for b2 in range(BATCH):
                for h in range(HEADS):
                    for j in range(N_TOK):
                        col = b2 * HN + h * N_TOK + j
                        if b2 != b or j == i:
                            c[AB_R0 + row, col] = MASK_VALUE
    # replication: row (b, h, j) <- k row (b, j)
    for b in range(BATCH):
        for h in range(HEADS):
            for j in range(N_TOK):
                c[REP_R0 + b * HN + h * N_TOK + j, b * N_TOK + j] = 1.0
    # cls gather (padded to 8 output rows)
    for b in range(BATCH):
        c[CLS_R0 + b, b * N_TOK] = 1.0
    # token scatter: token row (b, 1 + i) <- patch row (b, i); cls rows stay zero
    for b in range(BATCH):
        for i in range(NUM_PATCHES):
            c[SEL_R0 + b * N_TOK + 1 + i, b * NUM_PATCHES + i] = 1.0
    return c


def _build_hmask_np():
    m = np.zeros((BHN, INNER_DIM), np.float32)
    for b in range(BATCH):
        for h in range(HEADS):
            m[b * HN + h * N_TOK:b * HN + (h + 1) * N_TOK,
              h * DIM_HEAD:(h + 1) * DIM_HEAD] = 1.0
    return m


_CONST_NP = _build_const_np()
_HMASK_NP = _build_hmask_np()


# ----------------------------- shared math helpers -----------------------------
def _layernorm(x, gamma, beta):
    mean = jnp.mean(x, axis=-1, keepdims=True)
    var = jnp.mean((x - mean) ** 2, axis=-1, keepdims=True)
    return (x - mean) * jax.lax.rsqrt(var + LN_EPS) * gamma + beta


def _gelu_exact(x):
    # torch nn.GELU() default = exact erf formulation
    return 0.5 * x * (1.0 + jax.lax.erf(x * 0.7071067811865475))


# ----------------------------- fused Pallas kernel -----------------------------
def sdvit_fused_kernel(scale_ref, pg_ref, spt_w_ref, misc_ref, vec_ref,
                       wqkv_ref, wo_ref, w1_ref, w2_ref, head_wb_ref, const_ref,
                       out_ref):
    # ---- unpack constant matrices (precomputed on host, one DMA) ----
    const = const_ref[...]
    agg = const[AGG_R0:AGG_R0 + BHN, 0:BHN]          # (40, 40)
    att_bias = const[AB_R0:AB_R0 + BN, 0:BHN]        # (10, 40)
    rep = const[REP_R0:REP_R0 + BHN, 0:BN]           # (40, 10)
    cls_sel = const[CLS_R0:CLS_R0 + OUT_ROWS, 0:BN]  # (8, 10)
    sel = const[SEL_R0:SEL_R0 + BN, 0:BP]            # (10, 8)

    misc = misc_ref[...]
    bias_rows = misc[0:BN]                           # (10, 32) cls + pos + spt_bias
    head_g = misc[HG_ROW:HG_ROW + 1]                 # (1, 32)
    head_b = misc[HB_ROW:HB_ROW + 1]                 # (1, 32)
    hmask = misc[HMASK_R0:HMASK_R0 + BHN]            # (40, 32)

    # ---- SPT patch embedding: LayerNorm + Linear (bias folded into bias_rows) ----
    pg = pg_ref[...]                                 # (10, 60): patches | spt_g | spt_b
    patches = pg[0:BP]
    spt_g = pg[BP:BP + 1]
    spt_b = pg[BP + 1:BP + 2]
    tok = jnp.dot(_layernorm(patches, spt_g, spt_b), spt_w_ref[...],
                  preferred_element_type=jnp.float32)              # (8, 32)

    # ---- cls token + positional embedding via constant scatter matmul ----
    x = jnp.dot(sel, tok, preferred_element_type=jnp.float32) + bias_rows   # (10, 32)

    for layer in range(DEPTH):
        vecs = vec_ref[layer]                                      # (8, 64)
        attn_g = vecs[0:1, 0:DIM]
        attn_b = vecs[1:2, 0:DIM]
        ff_g = vecs[2:3, 0:DIM]
        ff_b = vecs[3:4, 0:DIM]
        bo = vecs[4:5, 0:DIM]
        b2 = vecs[5:6, 0:DIM]
        b1 = vecs[6:7, 0:MLP_DIM]
        scale = scale_ref[layer]                                   # exp(temperature), SMEM scalar

        # ---- LSA attention (pre-norm, residual): one block-diag pass over B & H ----
        xn = _layernorm(x, attn_g, attn_b)
        qkv = jnp.dot(xn, wqkv_ref[layer], preferred_element_type=jnp.float32)  # (10, 96)
        q = qkv[:, 0:INNER_DIM]
        k = qkv[:, INNER_DIM:2 * INNER_DIM]
        v = qkv[:, 2 * INNER_DIM:3 * INNER_DIM]

        # block-diagonal K/V built on the MXU (no sublane concats)
        k_bd = jnp.dot(rep, k, preferred_element_type=jnp.float32) * hmask      # (40, 32)
        v_bd = jnp.dot(rep, v, preferred_element_type=jnp.float32) * hmask      # (40, 32)

        dots = jax.lax.dot_general(q, k_bd, (((1,), (1,)), ((), ())),
                                   preferred_element_type=jnp.float32)
        dots = dots * scale + att_bias                                           # (10, 40)
        # global row max is a valid shift for per-block softmax (see review note)
        dots = dots - jnp.max(dots, axis=-1, keepdims=True)
        e = jnp.exp(dots)
        denom = jnp.dot(e, agg, preferred_element_type=jnp.float32)              # per-block sums
        attn = e / jnp.maximum(denom, 1e-30)
        ctx = jnp.dot(attn, v_bd, preferred_element_type=jnp.float32)            # (10, 32)
        x = x + jnp.dot(ctx, wo_ref[layer], preferred_element_type=jnp.float32) + bo

        # ---- FeedForward (pre-norm, residual) ----
        xn = _layernorm(x, ff_g, ff_b)
        h = jnp.dot(xn, w1_ref[layer], preferred_element_type=jnp.float32) + b1
        h = _gelu_exact(h)
        x = x + jnp.dot(h, w2_ref[layer], preferred_element_type=jnp.float32) + b2

    # ---- mlp head on cls rows (constant-matrix gather, lane-dense padded output) ----
    cls_rows = jnp.dot(cls_sel, x, preferred_element_type=jnp.float32)           # (8, 32)
    hw = head_wb_ref[...]
    head_w = hw[0:DIM]                                                           # (32, 128)
    head_bias = hw[DIM:DIM + 1]                                                  # (1, 128)
    out_ref[...] = jnp.dot(_layernorm(cls_rows, head_g, head_b), head_w,
                           preferred_element_type=jnp.float32) + head_bias       # (8, 128)


# ----------------------------- wrapper (packing + pallas_call) -----------------------------
def spt_rearrange(x, patch_size):
    """SPT shifts + concat + Rearrange('b c (n p) -> b n (p c)') — cheap JAX glue."""
    b, c, L = x.shape
    z_seq = jnp.zeros((b, c, 1), x.dtype)
    shift_right = jnp.concatenate([z_seq, x[:, :, :-1]], axis=2)   # F.pad(x,(1,-1,0,0))
    shift_left = jnp.concatenate([x[:, :, 1:], z_seq], axis=2)     # F.pad(x,(-1,1,0,0))
    z_ch = jnp.zeros((b, 1, L), x.dtype)
    shift_ch_dn = jnp.concatenate([z_ch, x[:, :-1, :]], axis=1)    # F.pad(x,(0,0,1,-1))
    shift_ch_up = jnp.concatenate([x[:, 1:, :], z_ch], axis=1)     # F.pad(x,(0,0,-1,1))
    xs = jnp.concatenate([x, shift_right, shift_left, shift_ch_dn, shift_ch_up], axis=1)
    c5 = 5 * c
    n = L // patch_size
    xp = xs.reshape(b, c5, n, patch_size)        # b c n p
    xp = jnp.transpose(xp, (0, 2, 3, 1))         # b n p c
    return xp.reshape(b, n, patch_size * c5)


def _pack_params(params):
    layers = params["layers"]
    stack = lambda name: jnp.stack([l[name] for l in layers], axis=0)

    # per-row bias buffer: cls rows get cls_token+pos[0]; token rows get pos[i]+spt_bias
    pos = params["pos_embedding"].reshape(N_TOK, DIM)
    cls_row = params["cls_token"].reshape(1, DIM) + pos[0:1]
    tok_rows = pos[1:] + params["spt_bias"]
    bias_rows = jnp.concatenate([cls_row, tok_rows] * BATCH, axis=0)           # (10, 32)

    misc = jnp.concatenate([
        bias_rows, params["head_g"], params["head_b"],
        jnp.zeros((HMASK_R0 - (BN + 2), DIM), jnp.float32),
        jnp.asarray(_HMASK_NP)], axis=0)                                       # (56, 32)

    def pad64(v):
        return jnp.pad(v, ((0, 0), (0, 64 - v.shape[1])))

    layer_vecs = jnp.stack([
        jnp.concatenate([pad64(l["attn_g"]), pad64(l["attn_b"]),
                         pad64(l["ff_g"]), pad64(l["ff_b"]),
                         pad64(l["bo"]), pad64(l["b2"]),
                         pad64(l["b1"]),
                         jnp.zeros((1, 64), jnp.float32)], axis=0)
        for l in layers], axis=0)                                              # (DEPTH, 8, 64)

    scales = jnp.concatenate(
        [jnp.exp(l["temperature"]).reshape(1) for l in layers], axis=0)        # (DEPTH,)

    head_wb = jnp.concatenate([
        jnp.pad(params["head_w"], ((0, 0), (0, HEAD_PAD - NUM_CLASSES))),
        jnp.pad(params["head_bias"], ((0, 0), (0, HEAD_PAD - NUM_CLASSES)))],
        axis=0)                                                                # (33, 128)

    return dict(
        scales=scales,
        spt_gb=jnp.concatenate([params["spt_g"], params["spt_b"]], axis=0),    # (2, 60)
        spt_w=params["spt_w"],                                                 # (60, 32)
        misc=misc,
        layer_vecs=layer_vecs,
        wqkv=stack("wqkv"),                                                    # (DEPTH, 32, 96)
        wo=stack("wo"), w1=stack("w1"), w2=stack("w2"),
        head_wb=head_wb,
    )


def sdvit_forward_pallas(series, params):
    B = series.shape[0]
    assert B == BATCH, "constant matrices are built for BATCH"
    patches = spt_rearrange(series, PATCH_SIZE).reshape(B * NUM_PATCHES, PATCH_DIM)

    p = _pack_params(params)
    pg = jnp.concatenate([patches, p["spt_gb"]], axis=0)                       # (10, 60)

    args = (p["scales"], pg, p["spt_w"], p["misc"], p["layer_vecs"],
            p["wqkv"], p["wo"], p["w1"], p["w2"], p["head_wb"],
            jnp.asarray(_CONST_NP))

    vmem = pltpu.MemorySpace.VMEM
    smem = pltpu.MemorySpace.SMEM
    out_padded = pl.pallas_call(
        sdvit_fused_kernel,
        in_specs=[pl.BlockSpec(memory_space=smem)]
                 + [pl.BlockSpec(memory_space=vmem)] * (len(args) - 1),
        out_specs=pl.BlockSpec(memory_space=vmem),
        out_shape=jax.ShapeDtypeStruct((OUT_ROWS, HEAD_PAD), jnp.float32),
    )(*args)
    return out_padded[:B, :NUM_CLASSES]


# ----------------------------- pure-JAX reference (validation only) -----------------------------
def sdvit_forward_ref(series, params):
    B = series.shape[0]
    patches = spt_rearrange(series, PATCH_SIZE)                    # (B, n, patch_dim)
    xn = _layernorm(patches, params["spt_g"], params["spt_b"])
    tok = xn @ params["spt_w"] + params["spt_bias"]
    cls = jnp.broadcast_to(params["cls_token"][None, None, :], (B, 1, DIM))
    x = jnp.concatenate([cls, tok], axis=1) + params["pos_embedding"][:, :N_TOK]
    for layer in params["layers"]:
        scale = jnp.exp(layer["temperature"])[0, 0]
        xn = _layernorm(x, layer["attn_g"], layer["attn_b"])
        qkv = xn @ layer["wqkv"]
        q, k, v = jnp.split(qkv, 3, axis=-1)
        rh = lambda t: t.reshape(B, N_TOK, HEADS, DIM_HEAD).transpose(0, 2, 1, 3)
        q, k, v = rh(q), rh(k), rh(v)
        dots = jnp.einsum("bhqd,bhkd->bhqk", q, k) * scale
        eye = jnp.eye(N_TOK, dtype=bool)
        dots = jnp.where(eye[None, None], MASK_VALUE, dots)
        attn = jax.nn.softmax(dots, axis=-1)
        ctx = jnp.einsum("bhqk,bhkd->bhqd", attn, v)
        ctx = ctx.transpose(0, 2, 1, 3).reshape(B, N_TOK, INNER_DIM)
        x = ctx @ layer["wo"] + layer["bo"] + x
        xn = _layernorm(x, layer["ff_g"], layer["ff_b"])
        h = _gelu_exact(xn @ layer["w1"] + layer["b1"])
        x = h @ layer["w2"] + layer["b2"] + x
    cls_out = x[:, 0]
    return (_layernorm(cls_out, params["head_g"], params["head_b"]) @ params["head_w"]
            + params["head_bias"])


# ----------------------------- deterministic params -----------------------------
def init_params(key):
    def nrm(k, shape, scale=0.02):
        return scale * jax.random.normal(k, shape, dtype=jnp.float32)

    keys = iter(jax.random.split(key, 8 + DEPTH * 6))
    p = {
        "spt_g": jnp.ones((1, PATCH_DIM), jnp.float32),
        "spt_b": jnp.zeros((1, PATCH_DIM), jnp.float32),
        "spt_w": nrm(next(keys), (PATCH_DIM, DIM)),
        "spt_bias": jnp.zeros((1, DIM), jnp.float32),
        "pos_embedding": jax.random.normal(next(keys), (1, N_TOK, DIM), dtype=jnp.float32),
        "cls_token": jax.random.normal(next(keys), (DIM,), dtype=jnp.float32),
        "head_g": jnp.ones((1, DIM), jnp.float32),
        "head_b": jnp.zeros((1, DIM), jnp.float32),
        "head_w": nrm(next(keys), (DIM, NUM_CLASSES)),
        "head_bias": jnp.zeros((1, NUM_CLASSES), jnp.float32),
        "layers": [],
    }
    for _ in range(DEPTH):
        p["layers"].append({
            "attn_g": jnp.ones((1, DIM), jnp.float32),
            "attn_b": jnp.zeros((1, DIM), jnp.float32),
            # learnable LSA temperature: scale = exp(temperature), init = log(dh^-0.5)
            "temperature": jnp.full((1, 1), math.log(DIM_HEAD ** -0.5), jnp.float32),
            "wqkv": nrm(next(keys), (DIM, 3 * INNER_DIM)),
            "wo": nrm(next(keys), (INNER_DIM, DIM)),
            "bo": jnp.zeros((1, DIM), jnp.float32),
            "ff_g": jnp.ones((1, DIM), jnp.float32),
            "ff_b": jnp.zeros((1, DIM), jnp.float32),
            "w1": nrm(next(keys), (DIM, MLP_DIM)),
            "b1": jnp.zeros((1, MLP_DIM), jnp.float32),
            "w2": nrm(next(keys), (MLP_DIM, DIM)),
            "b2": jnp.zeros((1, DIM), jnp.float32),
        })
    return p


# ----------------------------- main -----------------------------
if __name__ == "__main__":
    key = jax.random.PRNGKey(0)
    k_param, k_data = jax.random.split(key)
    params = init_params(k_param)
    series = jax.random.normal(k_data, (BATCH, CHANNELS, SEQ_LEN), dtype=jnp.float32)

    fwd = jax.jit(sdvit_forward_pallas)
    out = jax.block_until_ready(fwd(series, params))
    assert out.shape == (BATCH, NUM_CLASSES) and out.dtype == jnp.float32

    # sanity check against a pure-JAX reference of the same math
    ref = jax.block_until_ready(sdvit_forward_ref(series, params))
    max_err = float(jnp.max(jnp.abs(out - ref)))
    assert max_err < 1e-2, f"mismatch vs reference: {max_err}"

    print("KERNEL_OK")
</pallas_src>

<mosaic_0001>
module attributes {stable_mosaic.version = 11 : i64} {
  func.func @sdvit_fused_kernel(%arg0: memref<2xf32, #tpu.memory_space<smem>>, %arg1: memref<10x60xf32, #tpu.memory_space<vmem>>, %arg2: memref<60x32xf32, #tpu.memory_space<vmem>>, %arg3: memref<56x32xf32, #tpu.memory_space<vmem>>, %arg4: memref<2x8x64xf32, #tpu.memory_space<vmem>>, %arg5: memref<2x32x96xf32, #tpu.memory_space<vmem>>, %arg6: memref<2x32x32xf32, #tpu.memory_space<vmem>>, %arg7: memref<2x32x64xf32, #tpu.memory_space<vmem>>, %arg8: memref<2x64x32xf32, #tpu.memory_space<vmem>>, %arg9: memref<33x128xf32, #tpu.memory_space<vmem>>, %arg10: memref<120x40xf32, #tpu.memory_space<vmem>>, %arg11: memref<8x128xf32, #tpu.memory_space<vmem>>) attributes {dimension_semantics = [], scalar_prefetch = 0 : i64, scratch_operands = 0 : i64, tpu.core_type = #tpu.core_type<tc>} {
    %c0 = arith.constant 0 : index
    %c0_0 = arith.constant 0 : index
    %0 = vector.load %arg10[%c0, %c0_0] : memref<120x40xf32, #tpu.memory_space<vmem>>, vector<120x40xf32>
    %1 = vector.extract_strided_slice %0 {offsets = [0, 0], sizes = [40, 40], strides = [1, 1]} : vector<120x40xf32> to vector<40x40xf32>
    %2 = vector.extract_strided_slice %0 {offsets = [40, 0], sizes = [10, 40], strides = [1, 1]} : vector<120x40xf32> to vector<10x40xf32>
    %3 = vector.extract_strided_slice %0 {offsets = [56, 0], sizes = [40, 10], strides = [1, 1]} : vector<120x40xf32> to vector<40x10xf32>
    %4 = vector.extract_strided_slice %0 {offsets = [96, 0], sizes = [8, 10], strides = [1, 1]} : vector<120x40xf32> to vector<8x10xf32>
    %5 = vector.extract_strided_slice %0 {offsets = [104, 0], sizes = [10, 8], strides = [1, 1]} : vector<120x40xf32> to vector<10x8xf32>
    %c0_1 = arith.constant 0 : index
    %c0_2 = arith.constant 0 : index
    %6 = vector.load %arg3[%c0_1, %c0_2] : memref<56x32xf32, #tpu.memory_space<vmem>>, vector<56x32xf32>
    %7 = vector.extract_strided_slice %6 {offsets = [0, 0], sizes = [10, 32], strides = [1, 1]} : vector<56x32xf32> to vector<10x32xf32>
    %8 = vector.extract_strided_slice %6 {offsets = [10, 0], sizes = [1, 32], strides = [1, 1]} : vector<56x32xf32> to vector<1x32xf32>
    %9 = vector.extract_strided_slice %6 {offsets = [11, 0], sizes = [1, 32], strides = [1, 1]} : vector<56x32xf32> to vector<1x32xf32>
    %10 = vector.extract_strided_slice %6 {offsets = [16, 0], sizes = [40, 32], strides = [1, 1]} : vector<56x32xf32> to vector<40x32xf32>
    %c0_3 = arith.constant 0 : index
    %c0_4 = arith.constant 0 : index
    %11 = vector.load %arg1[%c0_3, %c0_4] : memref<10x60xf32, #tpu.memory_space<vmem>>, vector<10x60xf32>
    %12 = vector.extract_strided_slice %11 {offsets = [0, 0], sizes = [8, 60], strides = [1, 1]} : vector<10x60xf32> to vector<8x60xf32>
    %13 = vector.extract_strided_slice %11 {offsets = [8, 0], sizes = [1, 60], strides = [1, 1]} : vector<10x60xf32> to vector<1x60xf32>
    %14 = vector.extract_strided_slice %11 {offsets = [9, 0], sizes = [1, 60], strides = [1, 1]} : vector<10x60xf32> to vector<1x60xf32>
    %cst = arith.constant dense<0.000000e+00> : vector<8xf32>
    %15 = vector.multi_reduction <add>, %12, %cst [1] : vector<8x60xf32> to vector<8xf32>
    %16 = vector.shape_cast %15 : vector<8xf32> to vector<8x1xf32>
    %cst_5 = arith.constant 6.000000e+01 : f32
    %17 = vector.broadcast %cst_5 : f32 to vector<8x1xf32>
    %18 = arith.divf %16, %17 : vector<8x1xf32>
    %19 = vector.broadcast %18 : vector<8x1xf32> to vector<8x60xf32>
    %20 = arith.subf %12, %19 : vector<8x60xf32>
    %21 = arith.mulf %20, %20 : vector<8x60xf32>
    %cst_6 = arith.constant dense<0.000000e+00> : vector<8xf32>
    %22 = vector.multi_reduction <add>, %21, %cst_6 [1] : vector<8x60xf32> to vector<8xf32>
    %23 = vector.shape_cast %22 : vector<8xf32> to vector<8x1xf32>
    %cst_7 = arith.constant 6.000000e+01 : f32
    %24 = vector.broadcast %cst_7 : f32 to vector<8x1xf32>
    %25 = arith.divf %23, %24 : vector<8x1xf32>
    %26 = vector.broadcast %18 : vector<8x1xf32> to vector<8x60xf32>
    %27 = arith.subf %12, %26 : vector<8x60xf32>
    %cst_8 = arith.constant 9.99999974E-6 : f32
    %28 = vector.broadcast %cst_8 : f32 to vector<8x1xf32>
    %29 = arith.addf %25, %28 : vector<8x1xf32>
    %30 = math.rsqrt %29 : vector<8x1xf32>
    %31 = vector.broadcast %30 : vector<8x1xf32> to vector<8x60xf32>
    %32 = arith.mulf %27, %31 : vector<8x60xf32>
    %33 = vector.broadcast %13 : vector<1x60xf32> to vector<8x60xf32>
    %34 = arith.mulf %32, %33 : vector<8x60xf32>
    %35 = vector.broadcast %14 : vector<1x60xf32> to vector<8x60xf32>
    %36 = arith.addf %34, %35 : vector<8x60xf32>
    %c0_9 = arith.constant 0 : index
    %c0_10 = arith.constant 0 : index
    %37 = vector.load %arg2[%c0_9, %c0_10] : memref<60x32xf32, #tpu.memory_space<vmem>>, vector<60x32xf32>
    %cst_11 = arith.constant dense<0.000000e+00> : vector<8x32xf32>
    %38 = tpu.matmul %36, %37, %cst_11 {dimension_numbers = #tpu.dot_dimension_numbers<[1], [0], [0], [1], [0, 0, 1, 1], [], []>} : vector<8x60xf32>, vector<60x32xf32>, vector<8x32xf32> -> vector<8x32xf32>
    %cst_12 = arith.constant dense<0.000000e+00> : vector<10x32xf32>
    %39 = tpu.matmul %5, %38, %cst_12 {dimension_numbers = #tpu.dot_dimension_numbers<[1], [0], [0], [1], [0, 0, 1, 1], [], []>} : vector<10x8xf32>, vector<8x32xf32>, vector<10x32xf32> -> vector<10x32xf32>
    %40 = arith.addf %39, %7 : vector<10x32xf32>
    %c0_13 = arith.constant 0 : index
    %c0_14 = arith.constant 0 : index
    %c0_15 = arith.constant 0 : index
    %41 = vector.load %arg4[%c0_13, %c0_14, %c0_15] : memref<2x8x64xf32, #tpu.memory_space<vmem>>, vector<1x8x64xf32>
    %42 = vector.shape_cast %41 : vector<1x8x64xf32> to vector<8x64xf32>
    %43 = vector.extract_strided_slice %42 {offsets = [0, 0], sizes = [1, 32], strides = [1, 1]} : vector<8x64xf32> to vector<1x32xf32>
    %44 = vector.extract_strided_slice %42 {offsets = [1, 0], sizes = [1, 32], strides = [1, 1]} : vector<8x64xf32> to vector<1x32xf32>
    %45 = vector.extract_strided_slice %42 {offsets = [2, 0], sizes = [1, 32], strides = [1, 1]} : vector<8x64xf32> to vector<1x32xf32>
    %46 = vector.extract_strided_slice %42 {offsets = [3, 0], sizes = [1, 32], strides = [1, 1]} : vector<8x64xf32> to vector<1x32xf32>
    %47 = vector.extract_strided_slice %42 {offsets = [4, 0], sizes = [1, 32], strides = [1, 1]} : vector<8x64xf32> to vector<1x32xf32>
    %48 = vector.extract_strided_slice %42 {offsets = [5, 0], sizes = [1, 32], strides = [1, 1]} : vector<8x64xf32> to vector<1x32xf32>
    %49 = vector.extract_strided_slice %42 {offsets = [6, 0], sizes = [1, 64], strides = [1, 1]} : vector<8x64xf32> to vector<1x64xf32>
    %c0_16 = arith.constant 0 : index
    %50 = memref.load %arg0[%c0_16] : memref<2xf32, #tpu.memory_space<smem>>
    %cst_17 = arith.constant dense<0.000000e+00> : vector<10xf32>
    %51 = vector.multi_reduction <add>, %40, %cst_17 [1] : vector<10x32xf32> to vector<10xf32>
    %52 = vector.shape_cast %51 : vector<10xf32> to vector<10x1xf32>
    %cst_18 = arith.constant 3.200000e+01 : f32
    %53 = vector.broadcast %cst_18 : f32 to vector<10x1xf32>
    %54 = arith.divf %52, %53 : vector<10x1xf32>
    %55 = vector.broadcast %54 : vector<10x1xf32> to vector<10x32xf32>
    %56 = arith.subf %40, %55 : vector<10x32xf32>
    %57 = arith.mulf %56, %56 : vector<10x32xf32>
    %cst_19 = arith.constant dense<0.000000e+00> : vector<10xf32>
    %58 = vector.multi_reduction <add>, %57, %cst_19 [1] : vector<10x32xf32> to vector<10xf32>
    %59 = vector.shape_cast %58 : vector<10xf32> to vector<10x1xf32>
    %cst_20 = arith.constant 3.200000e+01 : f32
    %60 = vector.broadcast %cst_20 : f32 to vector<10x1xf32>
    %61 = arith.divf %59, %60 : vector<10x1xf32>
    %62 = vector.broadcast %54 : vector<10x1xf32> to vector<10x32xf32>
    %63 = arith.subf %40, %62 : vector<10x32xf32>
    %cst_21 = arith.constant 9.99999974E-6 : f32
    %64 = vector.broadcast %cst_21 : f32 to vector<10x1xf32>
    %65 = arith.addf %61, %64 : vector<10x1xf32>
    %66 = math.rsqrt %65 : vector<10x1xf32>
    %67 = vector.broadcast %66 : vector<10x1xf32> to vector<10x32xf32>
    %68 = arith.mulf %63, %67 : vector<10x32xf32>
    %69 = vector.broadcast %43 : vector<1x32xf32> to vector<10x32xf32>
    %70 = arith.mulf %68, %69 : vector<10x32xf32>
    %71 = vector.broadcast %44 : vector<1x32xf32> to vector<10x32xf32>
    %72 = arith.addf %70, %71 : vector<10x32xf32>
    %c0_22 = arith.constant 0 : index
    %c0_23 = arith.constant 0 : index
    %c0_24 = arith.constant 0 : index
    %73 = vector.load %arg5[%c0_22, %c0_23, %c0_24] : memref<2x32x96xf32, #tpu.memory_space<vmem>>, vector<1x32x96xf32>
    %74 = vector.shape_cast %73 : vector<1x32x96xf32> to vector<32x96xf32>
    %cst_25 = arith.constant dense<0.000000e+00> : vector<10x96xf32>
    %75 = tpu.matmul %72, %74, %cst_25 {dimension_numbers = #tpu.dot_dimension_numbers<[1], [0], [0], [1], [0, 0, 1, 1], [], []>} : vector<10x32xf32>, vector<32x96xf32>, vector<10x96xf32> -> vector<10x96xf32>
    %76 = vector.extract_strided_slice %75 {offsets = [0, 0], sizes = [10, 32], strides = [1, 1]} : vector<10x96xf32> to vector<10x32xf32>
    %77 = vector.extract_strided_slice %75 {offsets = [0, 32], sizes = [10, 32], strides = [1, 1]} : vector<10x96xf32> to vector<10x32xf32>
    %78 = vector.extract_strided_slice %75 {offsets = [0, 64], sizes = [10, 32], strides = [1, 1]} : vector<10x96xf32> to vector<10x32xf32>
    %cst_26 = arith.constant dense<0.000000e+00> : vector<40x32xf32>
    %79 = tpu.matmul %3, %77, %cst_26 {dimension_numbers = #tpu.dot_dimension_numbers<[1], [0], [0], [1], [0, 0, 1, 1], [], []>} : vector<40x10xf32>, vector<10x32xf32>, vector<40x32xf32> -> vector<40x32xf32>
    %80 = arith.mulf %79, %10 : vector<40x32xf32>
    %cst_27 = arith.constant dense<0.000000e+00> : vector<40x32xf32>
    %81 = tpu.matmul %3, %78, %cst_27 {dimension_numbers = #tpu.dot_dimension_numbers<[1], [0], [0], [1], [0, 0, 1, 1], [], []>} : vector<40x10xf32>, vector<10x32xf32>, vector<40x32xf32> -> vector<40x32xf32>
    %82 = arith.mulf %81, %10 : vector<40x32xf32>
    %cst_28 = arith.constant dense<0.000000e+00> : vector<10x40xf32>
    %83 = tpu.matmul %76, %80, %cst_28 {dimension_numbers = #tpu.dot_dimension_numbers<[1], [1], [0], [0], [0, 0, 1, 0], [], []>} : vector<10x32xf32>, vector<40x32xf32>, vector<10x40xf32> -> vector<10x40xf32>
    %84 = vector.broadcast %50 : f32 to vector<10x40xf32>
    %85 = arith.mulf %83, %84 : vector<10x40xf32>
    %86 = arith.addf %85, %2 : vector<10x40xf32>
    %cst_29 = arith.constant dense<0xFF800000> : vector<10xf32>
    %87 = vector.multi_reduction <maximumf>, %86, %cst_29 [1] : vector<10x40xf32> to vector<10xf32>
    %88 = vector.shape_cast %87 : vector<10xf32> to vector<10x1xf32>
    %89 = vector.broadcast %88 : vector<10x1xf32> to vector<10x40xf32>
    %90 = arith.subf %86, %89 : vector<10x40xf32>
    %91 = math.exp %90 : vector<10x40xf32>
    %cst_30 = arith.constant dense<0.000000e+00> : vector<10x40xf32>
    %92 = tpu.matmul %91, %1, %cst_30 {dimension_numbers = #tpu.dot_dimension_numbers<[1], [0], [0], [1], [0, 0, 1, 1], [], []>} : vector<10x40xf32>, vector<40x40xf32>, vector<10x40xf32> -> vector<10x40xf32>
    %cst_31 = arith.constant 1.000000e-30 : f32
    %93 = vector.broadcast %cst_31 : f32 to vector<10x40xf32>
    %94 = arith.maximumf %92, %93 : vector<10x40xf32>
    %95 = arith.divf %91, %94 : vector<10x40xf32>
    %cst_32 = arith.constant dense<0.000000e+00> : vector<10x32xf32>
    %96 = tpu.matmul %95, %82, %cst_32 {dimension_numbers = #tpu.dot_dimension_numbers<[1], [0], [0], [1], [0, 0, 1, 1], [], []>} : vector<10x40xf32>, vector<40x32xf32>, vector<10x32xf32> -> vector<10x32xf32>
    %c0_33 = arith.constant 0 : index
    %c0_34 = arith.constant 0 : index
    %c0_35 = arith.constant 0 : index
    %97 = vector.load %arg6[%c0_33, %c0_34, %c0_35] : memref<2x32x32xf32, #tpu.memory_space<vmem>>, vector<1x32x32xf32>
    %98 = vector.shape_cast %97 : vector<1x32x32xf32> to vector<32x32xf32>
    %cst_36 = arith.constant dense<0.000000e+00> : vector<10x32xf32>
    %99 = tpu.matmul %96, %98, %cst_36 {dimension_numbers = #tpu.dot_dimension_numbers<[1], [0], [0], [1], [0, 0, 1, 1], [], []>} : vector<10x32xf32>, vector<32x32xf32>, vector<10x32xf32> -> vector<10x32xf32>
    %100 = arith.addf %40, %99 : vector<10x32xf32>
    %101 = vector.broadcast %47 : vector<1x32xf32> to vector<10x32xf32>
    %102 = arith.addf %100, %101 : vector<10x32xf32>
    %cst_37 = arith.constant dense<0.000000e+00> : vector<10xf32>
    %103 = vector.multi_reduction <add>, %102, %cst_37 [1] : vector<10x32xf32> to vector<10xf32>
    %104 = vector.shape_cast %103 : vector<10xf32> to vector<10x1xf32>
    %cst_38 = arith.constant 3.200000e+01 : f32
    %105 = vector.broadcast %cst_38 : f32 to vector<10x1xf32>
    %106 = arith.divf %104, %105 : vector<10x1xf32>
    %107 = vector.broadcast %106 : vector<10x1xf32> to vector<10x32xf32>
    %108 = arith.subf %102, %107 : vector<10x32xf32>
    %109 = arith.mulf %108, %108 : vector<10x32xf32>
    %cst_39 = arith.constant dense<0.000000e+00> : vector<10xf32>
    %110 = vector.multi_reduction <add>, %109, %cst_39 [1] : vector<10x32xf32> to vector<10xf32>
    %111 = vector.shape_cast %110 : vector<10xf32> to vector<10x1xf32>
    %cst_40 = arith.constant 3.200000e+01 : f32
    %112 = vector.broadcast %cst_40 : f32 to vector<10x1xf32>
    %113 = arith.divf %111, %112 : vector<10x1xf32>
    %114 = vector.broadcast %106 : vector<10x1xf32> to vector<10x32xf32>
    %115 = arith.subf %102, %114 : vector<10x32xf32>
    %cst_41 = arith.constant 9.99999974E-6 : f32
    %116 = vector.broadcast %cst_41 : f32 to vector<10x1xf32>
    %117 = arith.addf %113, %116 : vector<10x1xf32>
    %118 = math.rsqrt %117 : vector<10x1xf32>
    %119 = vector.broadcast %118 : vector<10x1xf32> to vector<10x32xf32>
    %120 = arith.mulf %115, %119 : vector<10x32xf32>
    %121 = vector.broadcast %45 : vector<1x32xf32> to vector<10x32xf32>
    %122 = arith.mulf %120, %121 : vector<10x32xf32>
    %123 = vector.broadcast %46 : vector<1x32xf32> to vector<10x32xf32>
    %124 = arith.addf %122, %123 : vector<10x32xf32>
    %c0_42 = arith.constant 0 : index
    %c0_43 = arith.constant 0 : index
    %c0_44 = arith.constant 0 : index
    %125 = vector.load %arg7[%c0_42, %c0_43, %c0_44] : memref<2x32x64xf32, #tpu.memory_space<vmem>>, vector<1x32x64xf32>
    %126 = vector.shape_cast %125 : vector<1x32x64xf32> to vector<32x64xf32>
    %cst_45 = arith.constant dense<0.000000e+00> : vector<10x64xf32>
    %127 = tpu.matmul %124, %126, %cst_45 {dimension_numbers = #tpu.dot_dimension_numbers<[1], [0], [0], [1], [0, 0, 1, 1], [], []>} : vector<10x32xf32>, vector<32x64xf32>, vector<10x64xf32> -> vector<10x64xf32>
    %128 = vector.broadcast %49 : vector<1x64xf32> to vector<10x64xf32>
    %129 = arith.addf %127, %128 : vector<10x64xf32>
    %cst_46 = arith.constant 5.000000e-01 : f32
    %130 = vector.broadcast %cst_46 : f32 to vector<10x64xf32>
    %131 = arith.mulf %130, %129 : vector<10x64xf32>
    %cst_47 = arith.constant 0.707106769 : f32
    %132 = vector.broadcast %cst_47 : f32 to vector<10x64xf32>
    %133 = arith.mulf %129, %132 : vector<10x64xf32>
    %134 = math.erf %133 : vector<10x64xf32>
    %cst_48 = arith.constant 1.000000e+00 : f32
    %135 = vector.broadcast %cst_48 : f32 to vector<10x64xf32>
    %136 = arith.addf %135, %134 : vector<10x64xf32>
    %137 = arith.mulf %131, %136 : vector<10x64xf32>
    %c0_49 = arith.constant 0 : index
    %c0_50 = arith.constant 0 : index
    %c0_51 = arith.constant 0 : index
    %138 = vector.load %arg8[%c0_49, %c0_50, %c0_51] : memref<2x64x32xf32, #tpu.memory_space<vmem>>, vector<1x64x32xf32>
    %139 = vector.shape_cast %138 : vector<1x64x32xf32> to vector<64x32xf32>
    %cst_52 = arith.constant dense<0.000000e+00> : vector<10x32xf32>
    %140 = tpu.matmul %137, %139, %cst_52 {dimension_numbers = #tpu.dot_dimension_numbers<[1], [0], [0], [1], [0, 0, 1, 1], [], []>} : vector<10x64xf32>, vector<64x32xf32>, vector<10x32xf32> -> vector<10x32xf32>
    %141 = arith.addf %102, %140 : vector<10x32xf32>
    %142 = vector.broadcast %48 : vector<1x32xf32> to vector<10x32xf32>
    %143 = arith.addf %141, %142 : vector<10x32xf32>
    %c1 = arith.constant 1 : index
    %c0_53 = arith.constant 0 : index
    %c0_54 = arith.constant 0 : index
    %144 = vector.load %arg4[%c1, %c0_53, %c0_54] : memref<2x8x64xf32, #tpu.memory_space<vmem>>, vector<1x8x64xf32>
    %145 = vector.shape_cast %144 : vector<1x8x64xf32> to vector<8x64xf32>
    %146 = vector.extract_strided_slice %145 {offsets = [0, 0], sizes = [1, 32], strides = [1, 1]} : vector<8x64xf32> to vector<1x32xf32>
    %147 = vector.extract_strided_slice %145 {offsets = [1, 0], sizes = [1, 32], strides = [1, 1]} : vector<8x64xf32> to vector<1x32xf32>
    %148 = vector.extract_strided_slice %145 {offsets = [2, 0], sizes = [1, 32], strides = [1, 1]} : vector<8x64xf32> to vector<1x32xf32>
    %149 = vector.extract_strided_slice %145 {offsets = [3, 0], sizes = [1, 32], strides = [1, 1]} : vector<8x64xf32> to vector<1x32xf32>
    %150 = vector.extract_strided_slice %145 {offsets = [4, 0], sizes = [1, 32], strides = [1, 1]} : vector<8x64xf32> to vector<1x32xf32>
    %151 = vector.extract_strided_slice %145 {offsets = [5, 0], sizes = [1, 32], strides = [1, 1]} : vector<8x64xf32> to vector<1x32xf32>
    %152 = vector.extract_strided_slice %145 {offsets = [6, 0], sizes = [1, 64], strides = [1, 1]} : vector<8x64xf32> to vector<1x64xf32>
    %c1_55 = arith.constant 1 : index
    %153 = memref.load %arg0[%c1_55] : memref<2xf32, #tpu.memory_space<smem>>
    %cst_56 = arith.constant dense<0.000000e+00> : vector<10xf32>
    %154 = vector.multi_reduction <add>, %143, %cst_56 [1] : vector<10x32xf32> to vector<10xf32>
    %155 = vector.shape_cast %154 : vector<10xf32> to vector<10x1xf32>
    %cst_57 = arith.constant 3.200000e+01 : f32
    %156 = vector.broadcast %cst_57 : f32 to vector<10x1xf32>
    %157 = arith.divf %155, %156 : vector<10x1xf32>
    %158 = vector.broadcast %157 : vector<10x1xf32> to vector<10x32xf32>
    %159 = arith.subf %143, %158 : vector<10x32xf32>
    %160 = arith.mulf %159, %159 : vector<10x32xf32>
    %cst_58 = arith.constant dense<0.000000e+00> : vector<10xf32>
    %161 = vector.multi_reduction <add>, %160, %cst_58 [1] : vector<10x32xf32> to vector<10xf32>
    %162 = vector.shape_cast %161 : vector<10xf32> to vector<10x1xf32>
    %cst_59 = arith.constant 3.200000e+01 : f32
    %163 = vector.broadcast %cst_59 : f32 to vector<10x1xf32>
    %164 = arith.divf %162, %163 : vector<10x1xf32>
    %165 = vector.broadcast %157 : vector<10x1xf32> to vector<10x32xf32>
    %166 = arith.subf %143, %165 : vector<10x32xf32>
    %cst_60 = arith.constant 9.99999974E-6 : f32
    %167 = vector.broadcast %cst_60 : f32 to vector<10x1xf32>
    %168 = arith.addf %164, %167 : vector<10x1xf32>
    %169 = math.rsqrt %168 : vector<10x1xf32>
    %170 = vector.broadcast %169 : vector<10x1xf32> to vector<10x32xf32>
    %171 = arith.mulf %166, %170 : vector<10x32xf32>
    %172 = vector.broadcast %146 : vector<1x32xf32> to vector<10x32xf32>
    %173 = arith.mulf %171, %172 : vector<10x32xf32>
    %174 = vector.broadcast %147 : vector<1x32xf32> to vector<10x32xf32>
    %175 = arith.addf %173, %174 : vector<10x32xf32>
    %c1_61 = arith.constant 1 : index
    %c0_62 = arith.constant 0 : index
    %c0_63 = arith.constant 0 : index
    %176 = vector.load %arg5[%c1_61, %c0_62, %c0_63] : memref<2x32x96xf32, #tpu.memory_space<vmem>>, vector<1x32x96xf32>
    %177 = vector.shape_cast %176 : vector<1x32x96xf32> to vector<32x96xf32>
    %cst_64 = arith.constant dense<0.000000e+00> : vector<10x96xf32>
    %178 = tpu.matmul %175, %177, %cst_64 {dimension_numbers = #tpu.dot_dimension_numbers<[1], [0], [0], [1], [0, 0, 1, 1], [], []>} : vector<10x32xf32>, vector<32x96xf32>, vector<10x96xf32> -> vector<10x96xf32>
    %179 = vector.extract_strided_slice %178 {offsets = [0, 0], sizes = [10, 32], strides = [1, 1]} : vector<10x96xf32> to vector<10x32xf32>
    %180 = vector.extract_strided_slice %178 {offsets = [0, 32], sizes = [10, 32], strides = [1, 1]} : vector<10x96xf32> to vector<10x32xf32>
    %181 = vector.extract_strided_slice %178 {offsets = [0, 64], sizes = [10, 32], strides = [1, 1]} : vector<10x96xf32> to vector<10x32xf32>
    %cst_65 = arith.constant dense<0.000000e+00> : vector<40x32xf32>
    %182 = tpu.matmul %3, %180, %cst_65 {dimension_numbers = #tpu.dot_dimension_numbers<[1], [0], [0], [1], [0, 0, 1, 1], [], []>} : vector<40x10xf32>, vector<10x32xf32>, vector<40x32xf32> -> vector<40x32xf32>
    %183 = arith.mulf %182, %10 : vector<40x32xf32>
    %cst_66 = arith.constant dense<0.000000e+00> : vector<40x32xf32>
    %184 = tpu.matmul %3, %181, %cst_66 {dimension_numbers = #tpu.dot_dimension_numbers<[1], [0], [0], [1], [0, 0, 1, 1], [], []>} : vector<40x10xf32>, vector<10x32xf32>, vector<40x32xf32> -> vector<40x32xf32>
    %185 = arith.mulf %184, %10 : vector<40x32xf32>
    %cst_67 = arith.constant dense<0.000000e+00> : vector<10x40xf32>
    %186 = tpu.matmul %179, %183, %cst_67 {dimension_numbers = #tpu.dot_dimension_numbers<[1], [1], [0], [0], [0, 0, 1, 0], [], []>} : vector<10x32xf32>, vector<40x32xf32>, vector<10x40xf32> -> vector<10x40xf32>
    %187 = vector.broadcast %153 : f32 to vector<10x40xf32>
    %188 = arith.mulf %186, %187 : vector<10x40xf32>
    %189 = arith.addf %188, %2 : vector<10x40xf32>
    %cst_68 = arith.constant dense<0xFF800000> : vector<10xf32>
    %190 = vector.multi_reduction <maximumf>, %189, %cst_68 [1] : vector<10x40xf32> to vector<10xf32>
    %191 = vector.shape_cast %190 : vector<10xf32> to vector<10x1xf32>
    %192 = vector.broadcast %191 : vector<10x1xf32> to vector<10x40xf32>
    %193 = arith.subf %189, %192 : vector<10x40xf32>
    %194 = math.exp %193 : vector<10x40xf32>
    %cst_69 = arith.constant dense<0.000000e+00> : vector<10x40xf32>
    %195 = tpu.matmul %194, %1, %cst_69 {dimension_numbers = #tpu.dot_dimension_numbers<[1], [0], [0], [1], [0, 0, 1, 1], [], []>} : vector<10x40xf32>, vector<40x40xf32>, vector<10x40xf32> -> vector<10x40xf32>
    %cst_70 = arith.constant 1.000000e-30 : f32
    %196 = vector.broadcast %cst_70 : f32 to vector<10x40xf32>
    %197 = arith.maximumf %195, %196 : vector<10x40xf32>
    %198 = arith.divf %194, %197 : vector<10x40xf32>
    %cst_71 = arith.constant dense<0.000000e+00> : vector<10x32xf32>
    %199 = tpu.matmul %198, %185, %cst_71 {dimension_numbers = #tpu.dot_dimension_numbers<[1], [0], [0], [1], [0, 0, 1, 1], [], []>} : vector<10x40xf32>, vector<40x32xf32>, vector<10x32xf32> -> vector<10x32xf32>
    %c1_72 = arith.constant 1 : index
    %c0_73 = arith.constant 0 : index
    %c0_74 = arith.constant 0 : index
    %200 = vector.load %arg6[%c1_72, %c0_73, %c0_74] : memref<2x32x32xf32, #tpu.memory_space<vmem>>, vector<1x32x32xf32>
    %201 = vector.shape_cast %200 : vector<1x32x32xf32> to vector<32x32xf32>
    %cst_75 = arith.constant dense<0.000000e+00> : vector<10x32xf32>
    %202 = tpu.matmul %199, %201, %cst_75 {dimension_numbers = #tpu.dot_dimension_numbers<[1], [0], [0], [1], [0, 0, 1, 1], [], []>} : vector<10x32xf32>, vector<32x32xf32>, vector<10x32xf32> -> vector<10x32xf32>
    %203 = arith.addf %143, %202 : vector<10x32xf32>
    %204 = vector.broadcast %150 : vector<1x32xf32> to vector<10x32xf32>
    %205 = arith.addf %203, %204 : vector<10x32xf32>
    %cst_76 = arith.constant dense<0.000000e+00> : vector<10xf32>
    %206 = vector.multi_reduction <add>, %205, %cst_76 [1] : vector<10x32xf32> to vector<10xf32>
    %207 = vector.shape_cast %206 : vector<10xf32> to vector<10x1xf32>
    %cst_77 = arith.constant 3.200000e+01 : f32
    %208 = vector.broadcast %cst_77 : f32 to vector<10x1xf32>
    %209 = arith.divf %207, %208 : vector<10x1xf32>
    %210 = vector.broadcast %209 : vector<10x1xf32> to vector<10x32xf32>
    %211 = arith.subf %205, %210 : vector<10x32xf32>
    %212 = arith.mulf %211, %211 : vector<10x32xf32>
    %cst_78 = arith.constant dense<0.000000e+00> : vector<10xf32>
    %213 = vector.multi_reduction <add>, %212, %cst_78 [1] : vector<10x32xf32> to vector<10xf32>
    %214 = vector.shape_cast %213 : vector<10xf32> to vector<10x1xf32>
    %cst_79 = arith.constant 3.200000e+01 : f32
    %215 = vector.broadcast %cst_79 : f32 to vector<10x1xf32>
    %216 = arith.divf %214, %215 : vector<10x1xf32>
    %217 = vector.broadcast %209 : vector<10x1xf32> to vector<10x32xf32>
    %218 = arith.subf %205, %217 : vector<10x32xf32>
    %cst_80 = arith.constant 9.99999974E-6 : f32
    %219 = vector.broadcast %cst_80 : f32 to vector<10x1xf32>
    %220 = arith.addf %216, %219 : vector<10x1xf32>
    %221 = math.rsqrt %220 : vector<10x1xf32>
    %222 = vector.broadcast %221 : vector<10x1xf32> to vector<10x32xf32>
    %223 = arith.mulf %218, %222 : vector<10x32xf32>
    %224 = vector.broadcast %148 : vector<1x32xf32> to vector<10x32xf32>
    %225 = arith.mulf %223, %224 : vector<10x32xf32>
    %226 = vector.broadcast %149 : vector<1x32xf32> to vector<10x32xf32>
    %227 = arith.addf %225, %226 : vector<10x32xf32>
    %c1_81 = arith.constant 1 : index
    %c0_82 = arith.constant 0 : index
    %c0_83 = arith.constant 0 : index
    %228 = vector.load %arg7[%c1_81, %c0_82, %c0_83] : memref<2x32x64xf32, #tpu.memory_space<vmem>>, vector<1x32x64xf32>
    %229 = vector.shape_cast %228 : vector<1x32x64xf32> to vector<32x64xf32>
    %cst_84 = arith.constant dense<0.000000e+00> : vector<10x64xf32>
    %230 = tpu.matmul %227, %229, %cst_84 {dimension_numbers = #tpu.dot_dimension_numbers<[1], [0], [0], [1], [0, 0, 1, 1], [], []>} : vector<10x32xf32>, vector<32x64xf32>, vector<10x64xf32> -> vector<10x64xf32>
    %231 = vector.broadcast %152 : vector<1x64xf32> to vector<10x64xf32>
    %232 = arith.addf %230, %231 : vector<10x64xf32>
    %cst_85 = arith.constant 5.000000e-01 : f32
    %233 = vector.broadcast %cst_85 : f32 to vector<10x64xf32>
    %234 = arith.mulf %233, %232 : vector<10x64xf32>
    %cst_86 = arith.constant 0.707106769 : f32
    %235 = vector.broadcast %cst_86 : f32 to vector<10x64xf32>
    %236 = arith.mulf %232, %235 : vector<10x64xf32>
    %237 = math.erf %236 : vector<10x64xf32>
    %cst_87 = arith.constant 1.000000e+00 : f32
    %238 = vector.broadcast %cst_87 : f32 to vector<10x64xf32>
    %239 = arith.addf %238, %237 : vector<10x64xf32>
    %240 = arith.mulf %234, %239 : vector<10x64xf32>
    %c1_88 = arith.constant 1 : index
    %c0_89 = arith.constant 0 : index
    %c0_90 = arith.constant 0 : index
    %241 = vector.load %arg8[%c1_88, %c0_89, %c0_90] : memref<2x64x32xf32, #tpu.memory_space<vmem>>, vector<1x64x32xf32>
    %242 = vector.shape_cast %241 : vector<1x64x32xf32> to vector<64x32xf32>
    %cst_91 = arith.constant dense<0.000000e+00> : vector<10x32xf32>
    %243 = tpu.matmul %240, %242, %cst_91 {dimension_numbers = #tpu.dot_dimension_numbers<[1], [0], [0], [1], [0, 0, 1, 1], [], []>} : vector<10x64xf32>, vector<64x32xf32>, vector<10x32xf32> -> vector<10x32xf32>
    %244 = arith.addf %205, %243 : vector<10x32xf32>
    %245 = vector.broadcast %151 : vector<1x32xf32> to vector<10x32xf32>
    %246 = arith.addf %244, %245 : vector<10x32xf32>
    %cst_92 = arith.constant dense<0.000000e+00> : vector<8x32xf32>
    %247 = tpu.matmul %4, %246, %cst_92 {dimension_numbers = #tpu.dot_dimension_numbers<[1], [0], [0], [1], [0, 0, 1, 1], [], []>} : vector<8x10xf32>, vector<10x32xf32>, vector<8x32xf32> -> vector<8x32xf32>
    %c0_93 = arith.constant 0 : index
    %c0_94 = arith.constant 0 : index
    %248 = vector.load %arg9[%c0_93, %c0_94] : memref<33x128xf32, #tpu.memory_space<vmem>>, vector<33x128xf32>
    %249 = vector.extract_strided_slice %248 {offsets = [0, 0], sizes = [32, 128], strides = [1, 1]} : vector<33x128xf32> to vector<32x128xf32>
    %250 = vector.extract_strided_slice %248 {offsets = [32, 0], sizes = [1, 128], strides = [1, 1]} : vector<33x128xf32> to vector<1x128xf32>
    %cst_95 = arith.constant dense<0.000000e+00> : vector<8xf32>
    %251 = vector.multi_reduction <add>, %247, %cst_95 [1] : vector<8x32xf32> to vector<8xf32>
    %252 = vector.shape_cast %251 : vector<8xf32> to vector<8x1xf32>
    %cst_96 = arith.constant 3.200000e+01 : f32
    %253 = vector.broadcast %cst_96 : f32 to vector<8x1xf32>
    %254 = arith.divf %252, %253 : vector<8x1xf32>
    %255 = vector.broadcast %254 : vector<8x1xf32> to vector<8x32xf32>
    %256 = arith.subf %247, %255 : vector<8x32xf32>
    %257 = arith.mulf %256, %256 : vector<8x32xf32>
    %cst_97 = arith.constant dense<0.000000e+00> : vector<8xf32>
    %258 = vector.multi_reduction <add>, %257, %cst_97 [1] : vector<8x32xf32> to vector<8xf32>
    %259 = vector.shape_cast %258 : vector<8xf32> to vector<8x1xf32>
    %cst_98 = arith.constant 3.200000e+01 : f32
    %260 = vector.broadcast %cst_98 : f32 to vector<8x1xf32>
    %261 = arith.divf %259, %260 : vector<8x1xf32>
    %262 = vector.broadcast %254 : vector<8x1xf32> to vector<8x32xf32>
    %263 = arith.subf %247, %262 : vector<8x32xf32>
    %cst_99 = arith.constant 9.99999974E-6 : f32
    %264 = vector.broadcast %cst_99 : f32 to vector<8x1xf32>
    %265 = arith.addf %261, %264 : vector<8x1xf32>
    %266 = math.rsqrt %265 : vector<8x1xf32>
    %267 = vector.broadcast %266 : vector<8x1xf32> to vector<8x32xf32>
    %268 = arith.mulf %263, %267 : vector<8x32xf32>
    %269 = vector.broadcast %8 : vector<1x32xf32> to vector<8x32xf32>
    %270 = arith.mulf %268, %269 : vector<8x32xf32>
    %271 = vector.broadcast %9 : vector<1x32xf32> to vector<8x32xf32>
    %272 = arith.addf %270, %271 : vector<8x32xf32>
    %cst_100 = arith.constant dense<0.000000e+00> : vector<8x128xf32>
    %273 = tpu.matmul %272, %249, %cst_100 {dimension_numbers = #tpu.dot_dimension_numbers<[1], [0], [0], [1], [0, 0, 1, 1], [], []>} : vector<8x32xf32>, vector<32x128xf32>, vector<8x128xf32> -> vector<8x128xf32>
    %274 = vector.broadcast %250 : vector<1x128xf32> to vector<8x128xf32>
    %275 = arith.addf %273, %274 : vector<8x128xf32>
    %c0_101 = arith.constant 0 : index
    %c0_102 = arith.constant 0 : index
    %276 = vector.load %arg11[%c0_101, %c0_102] : memref<8x128xf32, #tpu.memory_space<vmem>>, vector<8x128xf32>
    tpu.vector_store %arg11[%c0_101, %c0_102], %275 {strides = array<i32>} : memref<8x128xf32, #tpu.memory_space<vmem>>, vector<8x128xf32>,
    return
  }
}

</mosaic_0001>

<bundles_post_ra>
// kernel: sdvit_forward_pallas.1
= control target key start
LH: loop header
LB: loop body
LE: loop exit
PB: predicated region body
PF: predicated region fallthrough
CT: control target
= control target key end

     0   :  { %16 = vsyncpa [#allocation3], 0  ;;  %s1611_s20 = smov [#allocation2]   ;;  %s2222_s0 = inlined_call_operand.vmem [shape: f32[2], index: 0, kind: input, shape index: {}]   ;;  %s2223_s1 = inlined_call_operand.vmem [shape: f32[10,60], index: 1, kind: input, shape index: {}]   ;;  %s2224_s2 = inlined_call_operand.vmem [shape: f32[60,32], index: 2, kind: input, shape index: {}]   ;;  %s2225_s3 = inlined_call_operand.vmem [shape: f32[56,32], index: 3, kind: input, shape index: {}]   ;;  %s2226_s4 = inlined_call_operand.vmem [shape: f32[2,8,64], index: 4, kind: input, shape index: {}]   ;;  %s2227_s5 = inlined_call_operand.vmem [shape: f32[2,32,96], index: 5, kind: input, shape index: {}]   ;;  %s2228_s6 = inlined_call_operand.vmem [shape: f32[2,32,32], index: 6, kind: input, shape index: {}]   ;;  %s2229_s7 = inlined_call_operand.vmem [shape: f32[2,32,64], index: 7, kind: input, shape index: {}]   ;;  %s2230_s8 = inlined_call_operand.vmem [shape: f32[2,64,32], index: 8, kind: input, shape index: {}]   ;;  %s2231_s9 = inlined_call_operand.vmem [shape: f32[33,128], index: 9, kind: input, shape index: {}]   ;;  %s2232_s10 = inlined_call_operand.vmem [shape: f32[120,40], index: 10, kind: input, shape index: {}]   ;;  %s2233_s11 = inlined_call_operand.vmem [shape: f32[8,128], index: 11, kind: output, shape index: {}]  }
   0x1   :  { %s22_s19 = sshll.u32 %s2222_s0, 4  ;;  %s23_s19 = int_to_ptr.vmem [resolvable:$true] %s22_s19 }
   0x2   :  { %25 = dma.vmem_to_smem %s23_s19, 16, %s1611_s20, [#allocation3]  }
   0x3   :  { %1609 = dma.done.wait [#allocation3], 16  }
   0x4   :  { %1610 = vsyncadd [#allocation3], 4294967280 }
   0x5   :  { %50 = sfence }
   0x6   :  { %v73_v0 = vld [vmem:[%s2223_s1] sm:$0xff]  ;;  %vm75_vm0 = vcmask 490496   ;;  %v1612_v2 = vmov 60.0   ;;  %v116_v14 = vld [vmem:[%s2224_s2 + $0x38] sm:$0xf]  ;;  %vm120_vm2 = vcmask 1043456  }
   0x7   :  { %v76_v1 = vsel %vm75_vm0, %v73_v0, 0.0  ;;  %1548 = vrcp.f32 %v1612_v2  ;;  %1447 = vmatpush.msk.msra.mxu0 %vm120_vm2, %v116_v14  ;;  %v115_v15 = vld [vmem:[%s2224_s2 + $0x30] sm:$0xff]  ;;  %v114_v16 = vld [vmem:[%s2224_s2 + $0x28] sm:$0xff]  ;;  %v113_v17 = vld [vmem:[%s2224_s2 + $0x20] sm:$0xff]  ;;  %vm144_vm6 = vcmask 64512   ;;  %vm176_vm7 = vcmask 261120  }
   0x8   :  { %77 = vadd.xlane.f32.xlu0 %v76_v1  ;;  %v112_v18 = vld [vmem:[%s2224_s2 + $0x18] sm:$0xff]  ;;  %v111_v19 = vld [vmem:[%s2224_s2 + $0x10] sm:$0xff]  ;;  %v110_v20 = vld [vmem:[%s2224_s2 + $0x8] sm:$0xff]  ;;  %vm180_vm8 = vcmask 254976   ;;  %v1613_v49 = vmov 32.0   ;;  %s1614_s17 = smov 96  }
   0x9   :  { %133 = vmatpush.msra.mxu0 %v115_v15  ;;  %v109_v21 = vld [vmem:[%s2224_s2] sm:$0xff]  ;;  %v74_v30 = vld [vmem:[%s2223_s1 + $0x8] sm:$0x3]  ;;  %v65_v40 = vld [vmem:[%s2232_s10 + $0x70] sm:$0xff]  ;;  %s1615_s18 = smov 64   ;;  %s175_s19 = sld [smem:[#allocation2]] }
   0xa   :  { %v105_v32 = vperm.slane %v74_v30, 0  ;;  %v107_v35 = vperm.slane %v74_v30, 1  ;;  %v64_v38 = vld [vmem:[%s2232_s10 + $0x68] sm:$0xff]  ;;  %v66_v41 = vld [vmem:[%s2225_s3] sm:$0xff]  ;;  %v238_v2 = vld [vmem:[%s2227_s5 + $0x18] sm:$0xff]  ;;  %vm422_vm2 = vcmask 326656  }
   0xb   :  { %134 = vmatpush.msra.mxu0 %v114_v16  ;;  %v67_v45 = vld [vmem:[%s2225_s3 + $0x8] sm:$0xff]  ;;  %257 = vmatpush.msra.mxu2 %v238_v2 }
   0xc   :  { %v1854_v2 = vld [vmem:[%s2232_s10 + $0x28] sm:$0xff] }
   0xd   :  { %v1549_v3 = vpop.eup %1548  ;;  %135 = vmatpush.msra.mxu0 %v113_v17  ;;  %v1757_v17 = vld [vmem:[%s2226_s4] sm:$0xff] }
   0xe   :  { %v80_v4 = vmul.f32 60.0, %v1549_v3  ;;  %vm84_vm1 = vweird.f32 %v1549_v3 }
   0xf   :  { %136 = vmatpush.msra.mxu0 %v112_v18 }
  0x10   :  { %v81_v5 = vsub.f32 1.0, %v80_v4  ;;  %v236_v4 = vld [vmem:[%s2227_s5 + $0x8] sm:$0xff] }
  0x11   :  { %137 = vmatpush.msra.mxu0 %v111_v19 }
  0x12   :  { %v82_v6 = vmul.f32 %v1549_v3, %v81_v5  ;;  %v235_v5 = vld [vmem:[%s2227_s5] sm:$0xff] }
  0x13   :  { %138 = vmatpush.msra.mxu0 %v110_v20 }
  0x14   :  { %v83_v7 = vadd.f32 %v1549_v3, %v82_v6 }
  0x15   :  { %139 = vmatpush.msra.mxu0 %v109_v21  ;;  %v229_v21 = vperm.slane %v1757_v17, 0 }
  0x16   :  { %v85_v8 = vsel %vm84_vm1, %v1549_v3, %v83_v7  ;;  %v237_v3 = vld [vmem:[%s2227_s5 + $0x10] sm:$0xff]  ;;  %vm275_vm1 = vcmask 80896  }
  0x17   :  { %258 = vmatpush.msra.mxu2 %v237_v3 }
  0x19   :  { %259 = vmatpush.msra.mxu2 %v236_v4 }
  0x1b   :  { %260 = vmatpush.msra.mxu2 %v235_v5 }
  0x7b   :  { %v78_v9 = vpop.xlane.xlu0 %77 }
  0x7c   :  { %v86_v10 = vmul.f32 %v85_v8, %v78_v9 }
  0x7e   :  { %v87_v11 = vsub.f32 %v73_v0, %v86_v10 }
  0x80   :  { %v88_v12 = vmul.f32 %v87_v11, %v87_v11 }
  0x82   :  { %v89_v13 = vsel %vm75_vm0, %v88_v12, 0.0 }
  0x83   :  { %90 = vadd.xlane.f32.xlu0 %v89_v13 }
  0xf6   :  { %v91_v22 = vpop.xlane.xlu0 %90 }
  0xf7   :  { %v92_v23 = vmul.f32 %v91_v22, %v85_v8 }
  0xf9   :  { %v93_v24 = vadd.f32 1e-05, %v92_v23 }
  0xfb   :  { %1550 = vrsqrt.f32 %v93_v24  ;;  %vm100_vm4 = vweird.f32 %v93_v24 }
  0xfc   :  { %1552 = vrcp.f32 %v1613_v49 }
 0x101   :  { %v1551_v25 = vpop.eup %1550 }
 0x102   :  { %v95_v26 = vmul.f32 %v1551_v25, %v93_v24  ;;  %vm101_vm3 = vweird.f32 %v1551_v25  ;;  %v1553_v50 = vpop.eup %1552 }
 0x103   :  { %vm102_vm5 = vmor %vm100_vm4, %vm101_vm3  ;;  %v185_v51 = vmul.f32 32.0, %v1553_v50  ;;  %vm189_vm9 = vweird.f32 %v1553_v50  ;;  %vm426_vm3 = vcmask 320512  }
 0x104   :  { %v96_v27 = vmul.f32 %v1551_v25, %v95_v26 }
 0x105   :  { %v186_v52 = vsub.f32 1.0, %v185_v51 }
 0x106   :  { %v97_v28 = vmul.f32 0.5, %v96_v27 }
 0x107   :  { %v187_v53 = vmul.f32 %v1553_v50, %v186_v52  ;;  %v1817_v52 = vld [vmem:[%s2225_s3 + $0x30] sm:$0xff] }
 0x108   :  { %v98_v29 = vsub.f32 1.5, %v97_v28 }
 0x109   :  { %v188_v54 = vadd.f32 %v1553_v50, %v187_v53 }
 0x10a   :  { %v99_v31 = vmul.f32 %v1551_v25, %v98_v29 }
 0x10b   :  { %v1732_v55 = vsel %vm189_vm9, %v1553_v50, %v188_v54 }
 0x10c   :  { %v103_v33 = vsel %vm102_vm5, %v1551_v25, %v99_v31  ;;  %v232_v25 = vperm.slane %v1757_v17, 1 }
 0x10d   :  { %v104_v34 = vmul.f32 %v103_v33, %v87_v11 }
 0x10f   :  { %v106_v36 = vmul.f32 %v105_v32, %v104_v34 }
 0x111   :  { %v108_v37 = vadd.f32 %v107_v35, %v106_v36 }
 0x113   :  { %1448 = vmatmul.msk.f32.vlgmr.msra.gmra.mxu0 %vm75_vm0, %v108_v37  ;;  %vm291_vm0 = vcmask 1041408  }
 0x190   :  { %v141_v39 = vpop.f32.mrf.mxu0 }
 0x191   :  { %166 = vmatpush.msra.mxu1 %v141_v39  ;;  %v1772_v39 = vld [vmem:[%s2232_s10 + $0x38] sm:$0xff] }
 0x192   :  { %1449 = vmatmul.msk.f32.vlgmr.msra.gmra.mxu1 %vm144_vm6, %v64_v38 }
 0x19a   :  { %1450 = vmatmul.msk.f32.gmra.mxu1 %vm144_vm6, %v65_v40 }
 0x20f   :  { %v168_v42 = vpop.f32.mrf.mxu1 }
 0x210   :  { %v1721_v43 = vadd.f32 %v168_v42, %v66_v41  ;;  %v1779_v42 = vld [vmem:[%s2232_s10 + $0x40] sm:$0xff] }
 0x212   :  { %v177_v44 = vsel %vm176_vm7, %v1721_v43, 0.0 }
 0x213   :  { %178 = vadd.xlane.f32.xlu1 %v177_v44  ;;  %v1788_v44 = vld [vmem:[%s2232_s10 + $0x48] sm:$0xff] }
 0x217   :  { %v171_v46 = vpop.f32.mrf.mxu1 }
 0x218   :  { %v1728_v47 = vadd.f32 %v171_v46, %v67_v45  ;;  %v1797_v45 = vld [vmem:[%s2232_s10 + $0x50] sm:$0xff]  ;;  %v1806_v46 = vld [vmem:[%s2232_s10 + $0x58] sm:$0xff] }
 0x21a   :  { %v181_v48 = vsel %vm180_vm8, %v1728_v47, 0.0 }
 0x21b   :  { %182 = vadd.xlane.f32.xlu1 %v181_v48 }
 0x286   :  { %v179_v56 = vpop.xlane.xlu1 %178 }
 0x287   :  { %v191_v57 = vmul.f32 %v1732_v55, %v179_v56  ;;  %v1823_v56 = vld [vmem:[%s2225_s3 + $0x28] sm:$0xff] }
 0x289   :  { %v193_v58 = vsub.f32 %v1721_v43, %v191_v57 }
 0x28b   :  { %v195_v59 = vmul.f32 %v193_v58, %v193_v58 }
 0x28d   :  { %v197_v60 = vsel %vm176_vm7, %v195_v59, 0.0 }
 0x28e   :  { %198 = vadd.xlane.f32.xlu2 %v197_v60  ;;  %v183_v61 = vpop.xlane.xlu1 %182  ;;  %v1837_v60 = vld [vmem:[%s2225_s3 + $0x18] sm:$0xff] }
 0x28f   :  { %v192_v62 = vmul.f32 %v1732_v55, %v183_v61 }
 0x291   :  { %v194_v63 = vsub.f32 %v1728_v47, %v192_v62  ;;  %v1844_v62 = vld [vmem:[%s2225_s3 + $0x10] sm:$0xff] }
 0x293   :  { %v196_v0 = vmul.f32 %v194_v63, %v194_v63 }
 0x295   :  { %v200_v1 = vsel %vm180_vm8, %v196_v0, 0.0  ;;  %v417_v0 = vstv %s175_s19 }
 0x296   :  { %201 = vadd.xlane.f32.xlu2 %v200_v1 }
 0x301   :  { %v199_v6 = vpop.xlane.xlu2 %198 }
 0x302   :  { %v203_v7 = vmul.f32 %v199_v6, %v1732_v55 }
 0x304   :  { %v205_v8 = vadd.f32 1e-05, %v203_v7  ;;  %v1861_v7 = vld [vmem:[%s2232_s10 + $0x30] sm:$0xff] }
 0x306   :  { %1554 = vrsqrt.f32 %v205_v8  ;;  %vm213_vm11 = vweird.f32 %v205_v8 }
 0x309   :  { %v202_v9 = vpop.xlane.xlu2 %201 }
 0x30a   :  { %v204_v10 = vmul.f32 %v202_v9, %v1732_v55 }
 0x30c   :  { %v1555_v11 = vpop.eup %1554  ;;  %v206_v12 = vadd.f32 1e-05, %v204_v10 }
 0x30d   :  { %v208_v13 = vmul.f32 %v1555_v11, %v205_v8  ;;  %vm214_vm10 = vweird.f32 %v1555_v11 }
 0x30e   :  { %1556 = vrsqrt.f32 %v206_v12  ;;  %vm215_vm12 = vmor %vm213_vm11, %vm214_vm10  ;;  %vm223_vm14 = vweird.f32 %v206_v12 }
 0x30f   :  { %v209_v14 = vmul.f32 %v1555_v11, %v208_v13  ;;  %v1880_v13 = vld [vmem:[%s2232_s10 + $0x10] sm:$0xff] }
 0x311   :  { %v210_v15 = vmul.f32 0.5, %v209_v14  ;;  %v1886_v14 = vld [vmem:[%s2232_s10 + $0x8] sm:$0xff] }
 0x313   :  { %v211_v16 = vsub.f32 1.5, %v210_v15  ;;  %v1892_v15 = vld [vmem:[%s2232_s10] sm:$0xff] }
 0x314   :  { %v1557_v18 = vpop.eup %1556 }
 0x315   :  { %v212_v19 = vmul.f32 %v1555_v11, %v211_v16  ;;  %v218_v20 = vmul.f32 %v1557_v18, %v206_v12  ;;  %vm224_vm13 = vweird.f32 %v1557_v18  ;;  %v1874_v12 = vld [vmem:[%s2232_s10 + $0x18] sm:$0xff] }
 0x316   :  { %vm225_vm15 = vmor %vm223_vm14, %vm224_vm13 }
 0x317   :  { %v216_v22 = vsel %vm215_vm12, %v1555_v11, %v212_v19  ;;  %v219_v23 = vmul.f32 %v1557_v18, %v218_v20  ;;  %v1868_v11 = vld [vmem:[%s2232_s10 + $0x20] sm:$0xff] }
 0x318   :  { %v227_v24 = vmul.f32 %v216_v22, %v193_v58  ;;  %v1830_v58 = vld [vmem:[%s2225_s3 + $0x20] sm:$0xff]  ;;  %453 = vmatpush.msrb.mxu0 %v1868_v11 }
 0x319   :  { %v220_v26 = vmul.f32 0.5, %v219_v23 }
 0x31a   :  { %v230_v27 = vmul.f32 %v229_v21, %v227_v24  ;;  %454 = vmatpush.msrb.mxu0 %v1874_v12 }
 0x31b   :  { %v221_v28 = vsub.f32 1.5, %v220_v26 }
 0x31c   :  { %v233_v29 = vadd.f32 %v232_v25, %v230_v27  ;;  %455 = vmatpush.msrb.mxu0 %v1880_v13 }
 0x31d   :  { %v222_v30 = vmul.f32 %v1557_v18, %v221_v28 }
 0x31e   :  { %1451 = vmatmul.msk.f32.vlgmr.msra.gmra.mxu2 %vm176_vm7, %v233_v29  ;;  %456 = vmatpush.msrb.mxu0 %v1886_v14 }
 0x31f   :  { %v226_v31 = vsel %vm225_vm15, %v1557_v18, %v222_v30 }
 0x320   :  { %v228_v32 = vmul.f32 %v226_v31, %v194_v63  ;;  %457 = vmatpush.msrb.mxu0 %v1892_v15 }
 0x322   :  { %v231_v33 = vmul.f32 %v229_v21, %v228_v32 }
 0x324   :  { %v234_v34 = vadd.f32 %v232_v25, %v231_v33 }
 0x326   :  { %1452 = vmatmul.msk.f32.gmra.mxu2 %vm176_vm7, %v234_v34 }
 0x3a1   :  { %v262_v35 = vpop.f32.mrf.mxu2 }
 0x3a2   :  { %270 = vrot.lane.b32.xlu1 %v262_v35, %s1614_s17 }
 0x3a9   :  { %v265_v36 = vpop.f32.mrf.mxu2 }
 0x3aa   :  { %333 = vrot.lane.b32.xlu2 %v265_v36, %s1615_s18  ;;  %272 = vrot.lane.b32.xlu0 %v265_v36, %s1614_s17 }
 0x3b2   :  { %331 = vrot.lane.b32.xlu0 %v262_v35, %s1615_s18 }
 0x404   :  { %v334_v37 = vpop.permute.xlu2 %333 }
 0x405   :  { %1459 = vmatpush.msk.msrb.mxu1 %vm291_vm0, %v334_v37 }
 0x414   :  { %v271_v40 = vpop.permute.xlu1 %270 }
 0x41c   :  { %v273_v38 = vpop.permute.xlu0 %272 }
 0x41d   :  { %1453 = vmatpush.msk.msra.mxu3 %vm291_vm0, %v273_v38  ;;  %v527_v38 = vld [vmem:[%s2228_s6 + $0x8] sm:$0xff] }
 0x41f   :  { %309 = vmatpush.msra.mxu3 %v271_v40 }
 0x420   :  { %1454 = vmatmul.msk.f32.vlgmr.msra.gmra.mxu3 %vm275_vm1, %v1772_v39 }
 0x424   :  { %v332_v41 = vpop.permute.xlu0 %331 }
 0x425   :  { %353 = vmatpush.msrb.mxu1 %v332_v41 }
 0x426   :  { %1460 = vmatmul.msk.f32.vlgmr.msrb.gmra.mxu1 %vm275_vm1, %v1772_v39 }
 0x428   :  { %1455 = vmatmul.msk.f32.gmra.mxu3 %vm275_vm1, %v1779_v42 }
 0x42e   :  { %1461 = vmatmul.msk.f32.gmra.mxu1 %vm275_vm1, %v1779_v42 }
 0x430   :  { %1456 = vmatmul.msk.f32.gmra.mxu3 %vm275_vm1, %v1788_v44 }
 0x436   :  { %1462 = vmatmul.msk.f32.gmra.mxu1 %vm275_vm1, %v1788_v44 }
 0x438   :  { %1457 = vmatmul.msk.f32.gmra.mxu3 %vm275_vm1, %v1797_v45 }
 0x43e   :  { %1463 = vmatmul.msk.f32.gmra.mxu1 %vm275_vm1, %v1797_v45 }
 0x440   :  { %1458 = vmatmul.msk.f32.gmra.mxu3 %vm275_vm1, %v1806_v46 }
 0x446   :  { %1464 = vmatmul.msk.f32.gmra.mxu1 %vm275_vm1, %v1806_v46 }
 0x4a3   :  { %v311_v48 = vpop.f32.mrf.mxu3  ;;  %v355_v16 = vpop.f32.mrf.mxu1 }
 0x4a4   :  { %v326_v63 = vmul.f32 %v311_v48, %v1844_v62  ;;  %v370_v34 = vmul.f32 %v355_v16, %v1844_v62 }
 0x4ab   :  { %v314_v49 = vpop.f32.mrf.mxu3  ;;  %v358_v18 = vpop.f32.mrf.mxu1 }
 0x4ac   :  { %v327_v61 = vmul.f32 %v314_v49, %v1837_v60  ;;  %v371_v33 = vmul.f32 %v358_v18, %v1837_v60 }
 0x4b3   :  { %v317_v50 = vpop.f32.mrf.mxu3  ;;  %v361_v22 = vpop.f32.mrf.mxu1 }
 0x4b4   :  { %v328_v59 = vmul.f32 %v317_v50, %v1830_v58  ;;  %v372_v32 = vmul.f32 %v361_v22, %v1830_v58 }
 0x4bb   :  { %v320_v51 = vpop.f32.mrf.mxu3  ;;  %v364_v27 = vpop.f32.mrf.mxu1 }
 0x4bc   :  { %v329_v57 = vmul.f32 %v320_v51, %v1823_v56  ;;  %v373_v30 = vmul.f32 %v364_v27, %v1823_v56 }
 0x4c3   :  { %v323_v53 = vpop.f32.mrf.mxu3  ;;  %v367_v29 = vpop.f32.mrf.mxu1 }
 0x4c4   :  { %v330_v54 = vmul.f32 %v323_v53, %v1817_v52  ;;  %v374_v31 = vmul.f32 %v367_v29, %v1817_v52 }
 0x4c6   :  { %1465 = vmatpush.xpose.msk.msrb.mxu2 %vm176_vm7, %v330_v54  ;;  %514 = vmatpush.msra.mxu0 %v374_v31 }
 0x4c8   :  { %515 = vmatpush.msra.mxu0 %v373_v30 }
 0x4ca   :  { %1466 = vmatpush.xpose.msk.msrb.mxu2 %vm176_vm7, %v329_v57  ;;  %516 = vmatpush.msra.mxu0 %v372_v32 }
 0x4cc   :  { %517 = vmatpush.msra.mxu0 %v371_v33 }
 0x4ce   :  { %1467 = vmatpush.xpose.msk.msrb.mxu2 %vm176_vm7, %v328_v59  ;;  %518 = vmatpush.msra.mxu0 %v370_v34 }
 0x4d2   :  { %1468 = vmatpush.xpose.msk.msrb.mxu2 %vm176_vm7, %v327_v61 }
 0x4d6   :  { %1469 = vmatpush.xpose.msk.msrb.mxu2 %vm176_vm7, %v326_v63 }
 0x4d9   :  { %1470 = vmatmul.msk.f32.vlgmr.msrb.gmra.mxu2 %vm176_vm7, %v262_v35  ;;  %v529_v35 = vld [vmem:[%s2228_s6 + $0x18] sm:$0xff] }
 0x4da   :  { %548 = vmatpush.msra.mxu2 %v529_v35 }
 0x4e1   :  { %1471 = vmatmul.msk.f32.gmra.mxu2 %vm176_vm7, %v265_v36  ;;  %v528_v36 = vld [vmem:[%s2228_s6 + $0x10] sm:$0xff] }
 0x4e2   :  { %549 = vmatpush.msra.mxu2 %v528_v36 }
 0x4e4   :  { %550 = vmatpush.msra.mxu2 %v527_v38 }
 0x55c   :  { %v411_v1 = vpop.f32.mrf.mxu2 }
 0x55d   :  { %v418_v3 = vmul.f32 %v417_v0, %v411_v1 }
 0x55f   :  { %v420_v4 = vadd.f32 %v418_v3, %v1854_v2 }
 0x561   :  { %v423_v5 = vsel %vm422_vm2, %v420_v4, -inf }
 0x562   :  { %424 = vmax.xlane.f32.xlu2 %v423_v5 }
 0x564   :  { %v414_v6 = vpop.f32.mrf.mxu2 }
 0x565   :  { %v419_v8 = vmul.f32 %v417_v0, %v414_v6 }
 0x567   :  { %v421_v9 = vadd.f32 %v419_v8, %v1861_v7 }
 0x569   :  { %v427_v10 = vsel %vm426_vm3, %v421_v9, -inf }
 0x56a   :  { %428 = vmax.xlane.f32.xlu1 %v427_v10 }
 0x5d5   :  { %v425_v19 = vpop.xlane.xlu2 %424 }
 0x5d6   :  { %v430_v20 = vsub.f32 %v420_v4, %v425_v19 }
 0x5d8   :  { %v432_v21 = vmul.f32 1.442695, %v430_v20 }
 0x5da   :  { %1558 = vpow2.f32 %v432_v21  ;;  %v526_v21 = vld [vmem:[%s2228_s6] sm:$0xff] }
 0x5db   :  { %551 = vmatpush.msra.mxu2 %v526_v21 }
 0x5dd   :  { %v429_v23 = vpop.xlane.xlu1 %428 }
 0x5de   :  { %v431_v24 = vsub.f32 %v421_v9, %v429_v23 }
 0x5e0   :  { %v1559_v25 = vpop.eup %1558  ;;  %v434_v26 = vmul.f32 1.442695, %v431_v24  ;;  %v561_v24 = vperm.slane %v1757_v17, 4 }
 0x5e1   :  { %1472 = vmatmul.msk.f32.vlgmr.msrb.gmra.mxu0 %vm422_vm2, %v1559_v25 }
 0x5e2   :  { %1560 = vpow2.f32 %v434_v26 }
 0x5e8   :  { %v1561_v28 = vpop.eup %1560 }
 0x5e9   :  { %1473 = vmatmul.msk.f32.gmra.mxu0 %vm422_vm2, %v1561_v28 }
 0x65e   :  { %v459_v37 = vpop.f32.mrf.mxu0 }
 0x65f   :  { %v465_v40 = vmax.f32 %v459_v37, 1e-30 }
 0x661   :  { %1562 = vrcp.f32 %v465_v40  ;;  %v478_v53 = vand.u32 2147483648, %v465_v40  ;;  %v476_v57 = vand.u32 2147483647, %v465_v40  ;;  %vm472_vm5 = vweird.f32 %v465_v40 }
 0x663   :  { %v479_v63 = vor.u32 1.1754944e-38, %v478_v53  ;;  %vm477_vm9 = vcmp.eq.f32.partialorder %v476_v57, 8.507059e+37 }
 0x666   :  { %v462_v41 = vpop.f32.mrf.mxu0 }
 0x667   :  { %v1563_v48 = vpop.eup %1562  ;;  %v466_v49 = vmax.f32 %v462_v41, 1e-30 }
 0x668   :  { %v468_v50 = vmul.f32 %v1563_v48, %v465_v40  ;;  %vm473_vm4 = vweird.f32 %v1563_v48 }
 0x669   :  { %1564 = vrcp.f32 %v466_v49  ;;  %vm474_vm6 = vmor %vm472_vm5, %vm473_vm4  ;;  %v493_v6 = vand.u32 2147483648, %v466_v49  ;;  %v491_v9 = vand.u32 2147483647, %v466_v49  ;;  %vm487_vm11 = vweird.f32 %v466_v49 }
 0x66a   :  { %v469_v51 = vsub.f32 1.0, %v468_v50  ;;  %v615_v50 = vld [vmem:[%s2229_s7 + $0x8] sm:$0xff] }
 0x66b   :  { %v494_v16 = vor.u32 1.1754944e-38, %v493_v6  ;;  %vm492_vm13 = vcmp.eq.f32.partialorder %v491_v9, 8.507059e+37 }
 0x66c   :  { %v470_v54 = vmul.f32 %v1563_v48, %v469_v51  ;;  %v614_v51 = vld [vmem:[%s2229_s7] sm:$0xff] }
 0x66e   :  { %v471_v59 = vadd.f32 %v1563_v48, %v470_v54 }
 0x66f   :  { %v1565_v61 = vpop.eup %1564 }
 0x670   :  { %v483_v0 = vmul.f32 %v1565_v61, %v466_v49  ;;  %v475_v1 = vsel %vm474_vm6, %v1563_v48, %v471_v59  ;;  %vm488_vm10 = vweird.f32 %v1565_v61  ;;  %v617_v48 = vld [vmem:[%s2229_s7 + $0x18] sm:$0xff]  ;;  %v616_v49 = vld [vmem:[%s2229_s7 + $0x10] sm:$0xff] }
 0x671   :  { %v480_v3 = vsel %vm477_vm9, %v479_v63, %v475_v1  ;;  %vm489_vm12 = vmor %vm487_vm11, %vm488_vm10  ;;  %637 = vmatpush.msrb.mxu3 %v617_v48  ;;  %v742_v48 = vld [vmem:[%s2230_s8 + $0x30] sm:$0xff] }
 0x672   :  { %v484_v4 = vsub.f32 1.0, %v483_v0  ;;  %v481_v5 = vmul.f32 %v1559_v25, %v480_v3 }
 0x673   :  { %638 = vmatpush.msrb.mxu3 %v616_v49 }
 0x674   :  { %1474 = vmatmul.msk.f32.vlgmr.msra.gmra.mxu0 %vm422_vm2, %v481_v5  ;;  %v485_v8 = vmul.f32 %v1565_v61, %v484_v4 }
 0x675   :  { %639 = vmatpush.msrb.mxu3 %v615_v50 }
 0x676   :  { %v486_v10 = vadd.f32 %v1565_v61, %v485_v8 }
 0x677   :  { %640 = vmatpush.msrb.mxu3 %v614_v51 }
 0x678   :  { %v490_v18 = vsel %vm489_vm12, %v1565_v61, %v486_v10  ;;  %v608_v10 = vperm.slane %v1757_v17, 2 }
 0x679   :  { %v495_v19 = vsel %vm492_vm13, %v494_v16, %v490_v18 }
 0x67a   :  { %v496_v20 = vmul.f32 %v1561_v28, %v495_v19 }
 0x67c   :  { %1475 = vmatmul.msk.f32.gmra.mxu0 %vm422_vm2, %v496_v20  ;;  %v611_v20 = vperm.slane %v1757_v17, 3 }
 0x6f1   :  { %v520_v22 = vpop.f32.mrf.mxu0 }
 0x6f2   :  { %1476 = vmatmul.msk.f32.vlgmr.msra.gmra.mxu2 %vm176_vm7, %v520_v22 }
 0x6f9   :  { %v523_v23 = vpop.f32.mrf.mxu0 }
 0x6fa   :  { %1477 = vmatmul.msk.f32.gmra.mxu2 %vm176_vm7, %v523_v23 }
 0x775   :  { %v553_v25 = vpop.f32.mrf.mxu2 }
 0x776   :  { %v559_v26 = vadd.f32 %v553_v25, %v1721_v43 }
 0x778   :  { %v1920_v27 = vadd.f32 %v561_v24, %v559_v26 }
 0x77a   :  { %v564_v28 = vsel %vm176_vm7, %v1920_v27, 0.0 }
 0x77b   :  { %565 = vadd.xlane.f32.xlu0 %v564_v28 }
 0x77d   :  { %v556_v29 = vpop.f32.mrf.mxu2 }
 0x77e   :  { %v560_v30 = vadd.f32 %v556_v29, %v1728_v47 }
 0x780   :  { %v1925_v31 = vadd.f32 %v561_v24, %v560_v30 }
 0x782   :  { %v567_v32 = vsel %vm180_vm8, %v1925_v31, 0.0 }
 0x783   :  { %568 = vadd.xlane.f32.xlu2 %v567_v32  ;;  %v618_v32 = vperm.slane %v1757_v17, 6 }
 0x7ee   :  { %v566_v33 = vpop.xlane.xlu0 %565 }
 0x7ef   :  { %v570_v34 = vmul.f32 %v566_v33, %v1732_v55 }
 0x7f1   :  { %v572_v43 = vsub.f32 %v1920_v27, %v570_v34 }
 0x7f3   :  { %v574_v35 = vmul.f32 %v572_v43, %v572_v43 }
 0x7f5   :  { %v576_v36 = vsel %vm176_vm7, %v574_v35, 0.0 }
 0x7f6   :  { %577 = vadd.xlane.f32.xlu1 %v576_v36  ;;  %v569_v37 = vpop.xlane.xlu2 %568 }
 0x7f7   :  { %v571_v38 = vmul.f32 %v569_v37, %v1732_v55 }
 0x7f9   :  { %v573_v47 = vsub.f32 %v1925_v31, %v571_v38  ;;  %v743_v38 = vld [vmem:[%s2230_s8 + $0x38] sm:$0xff] }
 0x7fa   :  { %759 = vmatpush.msrb.mxu0 %v743_v38 }
 0x7fb   :  { %v575_v40 = vmul.f32 %v573_v47, %v573_v47 }
 0x7fc   :  { %760 = vmatpush.msrb.mxu0 %v742_v48 }
 0x7fd   :  { %v579_v41 = vsel %vm180_vm8, %v575_v40, 0.0 }
 0x7fe   :  { %580 = vadd.xlane.f32.xlu0 %v579_v41 }
 0x869   :  { %v578_v53 = vpop.xlane.xlu1 %577 }
 0x86a   :  { %v582_v54 = vmul.f32 %v578_v53, %v1732_v55  ;;  %v741_v53 = vld [vmem:[%s2230_s8 + $0x28] sm:$0xff] }
 0x86b   :  { %761 = vmatpush.msrb.mxu0 %v741_v53 }
 0x86c   :  { %v584_v57 = vadd.f32 1e-05, %v582_v54 }
 0x86e   :  { %1566 = vrsqrt.f32 %v584_v57  ;;  %vm592_vm15 = vweird.f32 %v584_v57 }
 0x871   :  { %v581_v59 = vpop.xlane.xlu0 %580 }
 0x872   :  { %v583_v61 = vmul.f32 %v581_v59, %v1732_v55 }
 0x874   :  { %v1567_v63 = vpop.eup %1566  ;;  %v585_v0 = vadd.f32 1e-05, %v583_v61  ;;  %v740_v61 = vld [vmem:[%s2230_s8 + $0x20] sm:$0xff] }
 0x875   :  { %v587_v1 = vmul.f32 %v1567_v63, %v584_v57  ;;  %vm593_vm14 = vweird.f32 %v1567_v63  ;;  %762 = vmatpush.msrb.mxu0 %v740_v61 }
 0x876   :  { %1568 = vrsqrt.f32 %v585_v0  ;;  %vm594_vm4 = vmor %vm592_vm15, %vm593_vm14  ;;  %vm602_vm6 = vweird.f32 %v585_v0 }
 0x877   :  { %v588_v3 = vmul.f32 %v1567_v63, %v587_v1 }
 0x879   :  { %v589_v4 = vmul.f32 0.5, %v588_v3  ;;  %v739_v3 = vld [vmem:[%s2230_s8 + $0x18] sm:$0xff] }
 0x87a   :  { %763 = vmatpush.msrb.mxu0 %v739_v3 }
 0x87b   :  { %v590_v5 = vsub.f32 1.5, %v589_v4 }
 0x87c   :  { %v1569_v6 = vpop.eup %1568 }
 0x87d   :  { %v591_v8 = vmul.f32 %v1567_v63, %v590_v5  ;;  %v597_v9 = vmul.f32 %v1569_v6, %v585_v0  ;;  %vm603_vm5 = vweird.f32 %v1569_v6 }
 0x87e   :  { %vm604_vm9 = vmor %vm602_vm6, %vm603_vm5 }
 0x87f   :  { %v595_v16 = vsel %vm594_vm4, %v1567_v63, %v591_v8  ;;  %v598_v18 = vmul.f32 %v1569_v6, %v597_v9  ;;  %v738_v8 = vld [vmem:[%s2230_s8 + $0x10] sm:$0xff]  ;;  %vm744_vm4 = vcmask 523264  }
 0x880   :  { %v606_v19 = vmul.f32 %v595_v16, %v572_v43  ;;  %764 = vmatpush.msrb.mxu0 %v738_v8 }
 0x881   :  { %v599_v21 = vmul.f32 0.5, %v598_v18 }
 0x882   :  { %v609_v22 = vmul.f32 %v608_v10, %v606_v19  ;;  %v737_v19 = vld [vmem:[%s2230_s8 + $0x8] sm:$0xff] }
 0x883   :  { %v600_v23 = vsub.f32 1.5, %v599_v21  ;;  %765 = vmatpush.msrb.mxu0 %v737_v19 }
 0x884   :  { %v612_v24 = vadd.f32 %v611_v20, %v609_v22 }
 0x885   :  { %v601_v25 = vmul.f32 %v1569_v6, %v600_v23  ;;  %v736_v23 = vld [vmem:[%s2230_s8] sm:$0xff] }
 0x886   :  { %1478 = vmatmul.msk.f32.vlgmr.msrb.gmra.mxu3 %vm176_vm7, %v612_v24  ;;  %766 = vmatpush.msrb.mxu0 %v736_v23 }
 0x887   :  { %v605_v26 = vsel %vm604_vm9, %v1569_v6, %v601_v25 }
 0x888   :  { %v607_v28 = vmul.f32 %v605_v26, %v573_v47 }
 0x88a   :  { %v610_v29 = vmul.f32 %v608_v10, %v607_v28 }
 0x88c   :  { %v613_v30 = vadd.f32 %v611_v20, %v610_v29 }
 0x88e   :  { %1479 = vmatmul.msk.f32.gmra.mxu3 %vm176_vm7, %v613_v30 }
 0x909   :  { %v642_v33 = vpop.f32.mrf.mxu3 }
 0x90a   :  { %v1954_v34 = vadd.f32 %v642_v33, %v618_v32 }
 0x90c   :  { %v1957_v43 = vmul.f32 0.70710677, %v1954_v34 }
 0x90e   :  { %v652_v35 = vmul.f32 %v1957_v43, %v1957_v43 }
 0x910   :  { %v653_v36 = vmin.f32 %v652_v35, 16.0 }
 0x911   :  { %v645_v37 = vpop.f32.mrf.mxu3 }
 0x912   :  { %v654_v47 = vmul.f32 2.1237322e-06, %v653_v36  ;;  %v665_v40 = vmul.f32 3.8918573e-05, %v653_v36  ;;  %v1964_v41 = vadd.f32 %v645_v37, %v618_v32 }
 0x914   :  { %v655_v49 = vadd.f32 0.00028619796, %v654_v47  ;;  %v666_v50 = vadd.f32 0.001143296, %v665_v40  ;;  %v1970_v51 = vmul.f32 0.70710677, %v1964_v41 }
 0x916   :  { %v656_v54 = vmul.f32 %v655_v49, %v653_v36  ;;  %v667_v57 = vmul.f32 %v666_v50, %v653_v36  ;;  %v692_v59 = vmul.f32 %v1970_v51, %v1970_v51 }
 0x918   :  { %v668_v63 = vadd.f32 0.014752088, %v667_v57  ;;  %v657_v0 = vadd.f32 0.0036580483, %v656_v54  ;;  %v693_v1 = vmin.f32 %v692_v59, 16.0 }
 0x91a   :  { %v669_v4 = vmul.f32 %v668_v63, %v653_v36  ;;  %v694_v5 = vmul.f32 2.1237322e-06, %v693_v1  ;;  %v705_v6 = vmul.f32 3.8918573e-05, %v693_v1  ;;  %v658_v10 = vmul.f32 %v657_v0, %v653_v36 }
 0x91c   :  { %v670_v9 = vadd.f32 0.112945676, %v669_v4  ;;  %v695_v16 = vadd.f32 0.00028619796, %v694_v5  ;;  %v706_v18 = vadd.f32 0.001143296, %v705_v6 }
 0x91d   :  { %v659_v25 = vadd.f32 0.05243302, %v658_v10 }
 0x91e   :  { %v671_v20 = vmul.f32 %v670_v9, %v653_v36  ;;  %v696_v21 = vmul.f32 %v695_v16, %v693_v1  ;;  %v707_v22 = vmul.f32 %v706_v18, %v693_v1 }
 0x91f   :  { %v660_v33 = vmul.f32 %v659_v25, %v653_v36 }
 0x920   :  { %v672_v24 = vadd.f32 0.4994258, %v671_v20  ;;  %v708_v26 = vadd.f32 0.014752088, %v707_v22  ;;  %v697_v29 = vadd.f32 0.0036580483, %v696_v21 }
 0x921   :  { %v661_v47 = vadd.f32 0.18741608, %v660_v33 }
 0x922   :  { %v673_v28 = vmul.f32 %v672_v24, %v653_v36  ;;  %v709_v30 = vmul.f32 %v708_v26, %v693_v1  ;;  %v698_v37 = vmul.f32 %v697_v29, %v693_v1 }
 0x923   :  { %v662_v53 = vmul.f32 %v661_v47, %v653_v36  ;;  %v649_v47 = vmul.f32 0.5, %v1964_v41 }
 0x924   :  { %v674_v32 = vadd.f32 1.0, %v673_v28  ;;  %v710_v35 = vadd.f32 0.112945676, %v709_v30  ;;  %v699_v48 = vadd.f32 0.05243302, %v698_v37  ;;  %v648_v28 = vmul.f32 0.5, %v1954_v34 }
 0x925   :  { %v663_v0 = vadd.f32 1.1283791, %v662_v53 }
 0x926   :  { %1570 = vrcp.f32 %v674_v32  ;;  %v711_v38 = vmul.f32 %v710_v35, %v693_v1  ;;  %v700_v59 = vmul.f32 %v699_v48, %v693_v1  ;;  %v686_v63 = vand.u32 2147483648, %v674_v32 }
 0x927   :  { %v684_v4 = vand.u32 2147483647, %v674_v32  ;;  %vm680_vm11 = vweird.f32 %v674_v32  ;;  %v664_v10 = vmul.f32 %v663_v0, %v1957_v43  ;;  %v776_v48 = vperm.slane %v1757_v17, 5 }
 0x928   :  { %v712_v40 = vadd.f32 0.4994258, %v711_v38  ;;  %v701_v5 = vadd.f32 0.18741608, %v700_v59  ;;  %v687_v8 = vor.u32 1.1754944e-38, %v686_v63 }
 0x929   :  { %vm685_vm13 = vcmp.eq.f32.partialorder %v684_v4, 8.507059e+37 }
 0x92a   :  { %v713_v49 = vmul.f32 %v712_v40, %v693_v1  ;;  %v702_v18 = vmul.f32 %v701_v5, %v693_v1 }
 0x92c   :  { %v1571_v50 = vpop.eup %1570  ;;  %v714_v57 = vadd.f32 1.0, %v713_v49  ;;  %v703_v24 = vadd.f32 1.1283791, %v702_v18 }
 0x92d   :  { %v676_v54 = vmul.f32 %v1571_v50, %v674_v32  ;;  %vm681_vm10 = vweird.f32 %v1571_v50 }
 0x92e   :  { %1572 = vrcp.f32 %v714_v57  ;;  %vm682_vm12 = vmor %vm680_vm11, %vm681_vm10  ;;  %v726_v23 = vand.u32 2147483648, %v714_v57  ;;  %v724_v26 = vand.u32 2147483647, %v714_v57  ;;  %vm720_vm15 = vweird.f32 %v714_v57 }
 0x92f   :  { %v677_v61 = vsub.f32 1.0, %v676_v54  ;;  %v704_v1 = vmul.f32 %v703_v24, %v1970_v51 }
 0x930   :  { %v727_v32 = vor.u32 1.1754944e-38, %v726_v23  ;;  %vm725_vm6 = vcmp.eq.f32.partialorder %v724_v26, 8.507059e+37 }
 0x931   :  { %v678_v3 = vmul.f32 %v1571_v50, %v677_v61 }
 0x933   :  { %v679_v6 = vadd.f32 %v1571_v50, %v678_v3 }
 0x934   :  { %v1573_v9 = vpop.eup %1572 }
 0x935   :  { %v683_v16 = vsel %vm682_vm12, %v1571_v50, %v679_v6  ;;  %v716_v19 = vmul.f32 %v1573_v9, %v714_v57  ;;  %vm721_vm14 = vweird.f32 %v1573_v9 }
 0x936   :  { %v688_v36 = vsel %vm685_vm13, %v687_v8, %v683_v16  ;;  %vm722_vm5 = vmor %vm720_vm15, %vm721_vm14  ;;  %v1489_v8 = vld [vmem:[%s2227_s5 + $0x38] sm:$0xff]  ;;  %v1486_v16 = vld [vmem:[%s2227_s5 + $0x20] sm:$0xff] }
 0x937   :  { %v689_v20 = vmul.f32 %v688_v36, %v664_v10  ;;  %v717_v21 = vsub.f32 1.0, %v716_v19  ;;  %855 = vmatpush.msra.mxu1 %v1489_v8  ;;  %v1487_v10 = vld [vmem:[%s2227_s5 + $0x28] sm:$0xff] }
 0x939   :  { %v1480_v22 = vclamps-f32 %v689_v20, 1.0  ;;  %v718_v25 = vmul.f32 %v1573_v9, %v717_v21 }
 0x93b   :  { %v732_v29 = vadd.f32 1.0, %v1480_v22  ;;  %v719_v30 = vadd.f32 %v1573_v9, %v718_v25 }
 0x93d   :  { %v734_v43 = vmul.f32 %v732_v29, %v648_v28  ;;  %v723_v33 = vsel %vm722_vm5, %v1573_v9, %v719_v30  ;;  %v1488_v9 = vld [vmem:[%s2227_s5 + $0x30] sm:$0xff] }
 0x93e   :  { %v728_v35 = vsel %vm725_vm6, %v727_v32, %v723_v33  ;;  %856 = vmatpush.msra.mxu1 %v1488_v9 }
 0x93f   :  { %1482 = vmatmul.msk.f32.vlgmr.msrb.gmra.mxu0 %vm744_vm4, %v734_v43  ;;  %v729_v37 = vmul.f32 %v728_v35, %v704_v1 }
 0x940   :  { %857 = vmatpush.msra.mxu1 %v1487_v10 }
 0x941   :  { %v1481_v38 = vclamps-f32 %v729_v37, 1.0 }
 0x942   :  { %858 = vmatpush.msra.mxu1 %v1486_v16 }
 0x943   :  { %v733_v40 = vadd.f32 1.0, %v1481_v38 }
 0x944   :  { %1032 = vmatpush.msrb.mxu1 %v1868_v11 }
 0x945   :  { %v735_v34 = vmul.f32 %v733_v40, %v649_v47 }
 0x946   :  { %1033 = vmatpush.msrb.mxu1 %v1874_v12  ;;  %v2037_v12 = vld [vmem:[%s2226_s4 + $0x8] sm:$0xff]  ;;  %s1485_s4 = sld [smem:[#allocation2 + $0x1]] }
 0x947   :  { %1483 = vmatmul.msk.f32.gmra.mxu0 %vm744_vm4, %v735_v34  ;;  %v829_v32 = vperm.slane %v2037_v12, 1 }
 0x948   :  { %1034 = vmatpush.msrb.mxu1 %v1880_v13 }
 0x94a   :  { %1035 = vmatpush.msrb.mxu1 %v1886_v14 }
 0x94c   :  { %1036 = vmatpush.msrb.mxu1 %v1892_v15  ;;  %v826_v15 = vperm.slane %v2037_v12, 0 }
 0x9bc   :  { %v768_v49 = vpop.f32.mrf.mxu0 }
 0x9bd   :  { %v774_v50 = vadd.f32 %v768_v49, %v1920_v27 }
 0x9bf   :  { %v2000_v53 = vadd.f32 %v776_v48, %v774_v50 }
 0x9c1   :  { %v782_v51 = vsel %vm176_vm7, %v2000_v53, 0.0 }
 0x9c2   :  { %783 = vadd.xlane.f32.xlu2 %v782_v51 }
 0x9c4   :  { %v771_v54 = vpop.f32.mrf.mxu0 }
 0x9c5   :  { %v775_v57 = vadd.f32 %v771_v54, %v1925_v31 }
 0x9c7   :  { %v2005_v59 = vadd.f32 %v776_v48, %v775_v57 }
 0x9c9   :  { %v785_v41 = vsel %vm180_vm8, %v2005_v59, 0.0 }
 0x9ca   :  { %786 = vadd.xlane.f32.xlu1 %v785_v41 }
 0xa35   :  { %v784_v61 = vpop.xlane.xlu2 %783 }
 0xa36   :  { %v788_v17 = vmul.f32 %v784_v61, %v1732_v55 }
 0xa38   :  { %v790_v27 = vsub.f32 %v2000_v53, %v788_v17 }
 0xa3a   :  { %v792_v63 = vmul.f32 %v790_v27, %v790_v27 }
 0xa3c   :  { %v794_v0 = vsel %vm176_vm7, %v792_v63, 0.0 }
 0xa3d   :  { %795 = vadd.xlane.f32.xlu0 %v794_v0  ;;  %v787_v3 = vpop.xlane.xlu1 %786 }
 0xa3e   :  { %v789_v4 = vmul.f32 %v787_v3, %v1732_v55  ;;  %v998_v3 = vstv %s1485_s4 }
 0xa40   :  { %v791_v31 = vsub.f32 %v2005_v59, %v789_v4 }
 0xa42   :  { %v793_v5 = vmul.f32 %v791_v31, %v791_v31 }
 0xa44   :  { %v797_v6 = vsel %vm180_vm8, %v793_v5, 0.0 }
 0xa45   :  { %798 = vadd.xlane.f32.xlu2 %v797_v6 }
 0xab0   :  { %v796_v36 = vpop.xlane.xlu0 %795 }
 0xab1   :  { %v800_v18 = vmul.f32 %v796_v36, %v1732_v55 }
 0xab3   :  { %v802_v19 = vadd.f32 1e-05, %v800_v18 }
 0xab5   :  { %1574 = vrsqrt.f32 %v802_v19  ;;  %vm810_vm10 = vweird.f32 %v802_v19 }
 0xab8   :  { %v799_v20 = vpop.xlane.xlu2 %798 }
 0xab9   :  { %v801_v21 = vmul.f32 %v799_v20, %v1732_v55 }
 0xabb   :  { %v1575_v22 = vpop.eup %1574  ;;  %v803_v24 = vadd.f32 1e-05, %v801_v21 }
 0xabc   :  { %v805_v23 = vmul.f32 %v1575_v22, %v802_v19  ;;  %vm811_vm9 = vweird.f32 %v1575_v22 }
 0xabd   :  { %1576 = vrsqrt.f32 %v803_v24  ;;  %vm812_vm11 = vmor %vm810_vm10, %vm811_vm9  ;;  %vm820_vm13 = vweird.f32 %v803_v24 }
 0xabe   :  { %v806_v11 = vmul.f32 %v1575_v22, %v805_v23 }
 0xac0   :  { %v807_v25 = vmul.f32 0.5, %v806_v11 }
 0xac2   :  { %v808_v13 = vsub.f32 1.5, %v807_v25 }
 0xac3   :  { %v1577_v26 = vpop.eup %1576 }
 0xac4   :  { %v809_v14 = vmul.f32 %v1575_v22, %v808_v13  ;;  %v815_v28 = vmul.f32 %v1577_v26, %v803_v24  ;;  %vm821_vm12 = vweird.f32 %v1577_v26 }
 0xac5   :  { %vm822_vm14 = vmor %vm820_vm13, %vm821_vm12 }
 0xac6   :  { %v813_v29 = vsel %vm812_vm11, %v1575_v22, %v809_v14  ;;  %v816_v43 = vmul.f32 %v1577_v26, %v815_v28 }
 0xac7   :  { %v824_v30 = vmul.f32 %v813_v29, %v790_v27 }
 0xac8   :  { %v817_v33 = vmul.f32 0.5, %v816_v43 }
 0xac9   :  { %v827_v1 = vmul.f32 %v826_v15, %v824_v30  ;;  %v1518_v30 = vld [vmem:[%s2228_s6 + $0x38] sm:$0xff] }
 0xaca   :  { %v818_v35 = vsub.f32 1.5, %v817_v33 }
 0xacb   :  { %v830_v37 = vadd.f32 %v829_v32, %v827_v1 }
 0xacc   :  { %v819_v38 = vmul.f32 %v1577_v26, %v818_v35 }
 0xacd   :  { %1490 = vmatmul.msk.f32.vlgmr.msra.gmra.mxu1 %vm176_vm7, %v830_v37 }
 0xace   :  { %v823_v47 = vsel %vm822_vm14, %v1577_v26, %v819_v38 }
 0xacf   :  { %v825_v40 = vmul.f32 %v823_v47, %v791_v31 }
 0xad1   :  { %v828_v34 = vmul.f32 %v826_v15, %v825_v40 }
 0xad3   :  { %v831_v48 = vadd.f32 %v829_v32, %v828_v34 }
 0xad5   :  { %1491 = vmatmul.msk.f32.gmra.mxu1 %vm176_vm7, %v831_v48 }
 0xb4a   :  { %v860_v49 = vpop.f32.mrf.mxu1 }
 0xb4b   :  { %868 = vrot.lane.b32.xlu0 %v860_v49, %s1614_s17 }
 0xb52   :  { %v863_v50 = vpop.f32.mrf.mxu1 }
 0xb53   :  { %912 = vrot.lane.b32.xlu0 %v860_v49, %s1615_s18  ;;  %914 = vrot.lane.b32.xlu2 %v863_v50, %s1615_s18 }
 0xb54   :  { %870 = vrot.lane.b32.xlu1 %v863_v50, %s1614_s17 }
 0xbad   :  { %v915_v51 = vpop.permute.xlu2 %914 }
 0xbae   :  { %1498 = vmatpush.msk.msra.mxu3 %vm291_vm0, %v915_v51 }
 0xbbd   :  { %v869_v54 = vpop.permute.xlu0 %868 }
 0xbc5   :  { %v913_v57 = vpop.permute.xlu0 %912 }
 0xbc6   :  { %v871_v41 = vpop.permute.xlu1 %870  ;;  %934 = vmatpush.msra.mxu3 %v913_v57 }
 0xbc7   :  { %1492 = vmatpush.msk.msrb.mxu2 %vm291_vm0, %v871_v41  ;;  %1499 = vmatmul.msk.f32.vlgmr.msra.gmra.mxu3 %vm275_vm1, %v1772_v39 }
 0xbc9   :  { %890 = vmatpush.msrb.mxu2 %v869_v54 }
 0xbca   :  { %1493 = vmatmul.msk.f32.vlgmr.msrb.gmra.mxu2 %vm275_vm1, %v1772_v39 }
 0xbcf   :  { %1500 = vmatmul.msk.f32.gmra.mxu3 %vm275_vm1, %v1779_v42 }
 0xbd2   :  { %1494 = vmatmul.msk.f32.gmra.mxu2 %vm275_vm1, %v1779_v42 }
 0xbd7   :  { %1501 = vmatmul.msk.f32.gmra.mxu3 %vm275_vm1, %v1788_v44 }
 0xbda   :  { %1495 = vmatmul.msk.f32.gmra.mxu2 %vm275_vm1, %v1788_v44 }
 0xbdf   :  { %1502 = vmatmul.msk.f32.gmra.mxu3 %vm275_vm1, %v1797_v45 }
 0xbe2   :  { %1496 = vmatmul.msk.f32.gmra.mxu2 %vm275_vm1, %v1797_v45 }
 0xbe7   :  { %1503 = vmatmul.msk.f32.gmra.mxu3 %vm275_vm1, %v1806_v46 }
 0xbea   :  { %1497 = vmatmul.msk.f32.gmra.mxu2 %vm275_vm1, %v1806_v46 }
 0xc4a   :  { %v936_v36 = vpop.f32.mrf.mxu3 }
 0xc4b   :  { %v951_v29 = vmul.f32 %v936_v36, %v1844_v62 }
 0xc4d   :  { %v892_v39 = vpop.f32.mrf.mxu2 }
 0xc4e   :  { %v907_v46 = vmul.f32 %v892_v39, %v1844_v62 }
 0xc52   :  { %v939_v18 = vpop.f32.mrf.mxu3 }
 0xc53   :  { %v952_v28 = vmul.f32 %v939_v18, %v1837_v60 }
 0xc55   :  { %v895_v42 = vpop.f32.mrf.mxu2 }
 0xc56   :  { %v908_v0 = vmul.f32 %v895_v42, %v1837_v60 }
 0xc5a   :  { %v942_v22 = vpop.f32.mrf.mxu3 }
 0xc5b   :  { %v953_v15 = vmul.f32 %v942_v22, %v1830_v58 }
 0xc5d   :  { %v898_v61 = vpop.f32.mrf.mxu2 }
 0xc5e   :  { %v909_v45 = vmul.f32 %v898_v61, %v1830_v58  ;;  %v1516_v58 = vld [vmem:[%s2228_s6 + $0x28] sm:$0xff] }
 0xc62   :  { %v945_v25 = vpop.f32.mrf.mxu3 }
 0xc63   :  { %v954_v26 = vmul.f32 %v945_v25, %v1823_v56  ;;  %v1521_v25 = vld [vmem:[%s2229_s7 + $0x20] sm:$0xff] }
 0xc65   :  { %v901_v17 = vpop.f32.mrf.mxu2 }
 0xc66   :  { %v910_v44 = vmul.f32 %v901_v17, %v1823_v56  ;;  %v1517_v56 = vld [vmem:[%s2228_s6 + $0x30] sm:$0xff] }
 0xc6d   :  { %v904_v27 = vpop.f32.mrf.mxu2 }
 0xc6e   :  { %v911_v63 = vmul.f32 %v904_v27, %v1817_v52 }
 0xc70   :  { %1504 = vmatpush.xpose.msk.msra.mxu0 %vm176_vm7, %v911_v63 }
 0xc74   :  { %1505 = vmatpush.xpose.msk.msra.mxu0 %vm176_vm7, %v910_v44  ;;  %v1515_v44 = vld [vmem:[%s2228_s6 + $0x20] sm:$0xff] }
 0xc78   :  { %1506 = vmatpush.xpose.msk.msra.mxu0 %vm176_vm7, %v909_v45 }
 0xc7c   :  { %1507 = vmatpush.xpose.msk.msra.mxu0 %vm176_vm7, %v908_v0 }
 0xc80   :  { %1508 = vmatpush.xpose.msk.msra.mxu0 %vm176_vm7, %v907_v46  ;;  %v1141_v46 = vperm.slane %v2037_v12, 4 }
 0xc83   :  { %1509 = vmatmul.msk.f32.vlgmr.msra.gmra.mxu0 %vm176_vm7, %v860_v49 }
 0xc84   :  { %1128 = vmatpush.msrb.mxu0 %v1518_v30 }
 0xc86   :  { %1129 = vmatpush.msrb.mxu0 %v1517_v56 }
 0xc88   :  { %1130 = vmatpush.msrb.mxu0 %v1516_v58 }
 0xc8a   :  { %1131 = vmatpush.msrb.mxu0 %v1515_v44 }
 0xc8b   :  { %1510 = vmatmul.msk.f32.gmra.mxu0 %vm176_vm7, %v863_v50 }
 0xd00   :  { %v992_v4 = vpop.f32.mrf.mxu0 }
 0xd01   :  { %v999_v31 = vmul.f32 %v998_v3, %v992_v4 }
 0xd03   :  { %v1001_v5 = vadd.f32 %v999_v31, %v1854_v2 }
 0xd05   :  { %v1003_v6 = vsel %vm422_vm2, %v1001_v5, -inf }
 0xd06   :  { %1004 = vmax.xlane.f32.xlu1 %v1003_v6 }
 0xd08   :  { %v995_v8 = vpop.f32.mrf.mxu0 }
 0xd09   :  { %v1000_v9 = vmul.f32 %v998_v3, %v995_v8 }
 0xd0b   :  { %v1002_v10 = vadd.f32 %v1000_v9, %v1861_v7  ;;  %v948_v7 = vpop.f32.mrf.mxu3 }
 0xd0c   :  { %v955_v14 = vmul.f32 %v948_v7, %v1817_v52 }
 0xd0d   :  { %v1006_v16 = vsel %vm426_vm3, %v1002_v10, -inf }
 0xd0e   :  { %1007 = vmax.xlane.f32.xlu2 %v1006_v16  ;;  %1093 = vmatpush.msra.mxu1 %v955_v14 }
 0xd10   :  { %1094 = vmatpush.msra.mxu1 %v954_v26 }
 0xd12   :  { %1095 = vmatpush.msra.mxu1 %v953_v15 }
 0xd14   :  { %1096 = vmatpush.msra.mxu1 %v952_v28 }
 0xd16   :  { %1097 = vmatpush.msra.mxu1 %v951_v29 }
 0xd79   :  { %v1005_v19 = vpop.xlane.xlu1 %1004 }
 0xd7a   :  { %v1009_v20 = vsub.f32 %v1001_v5, %v1005_v19 }
 0xd7c   :  { %v1011_v21 = vmul.f32 1.442695, %v1009_v20 }
 0xd7e   :  { %1578 = vpow2.f32 %v1011_v21 }
 0xd81   :  { %v1008_v23 = vpop.xlane.xlu2 %1007 }
 0xd82   :  { %v1010_v24 = vsub.f32 %v1002_v10, %v1008_v23 }
 0xd84   :  { %v1579_v2 = vpop.eup %1578  ;;  %v1013_v11 = vmul.f32 1.442695, %v1010_v24  ;;  %v1524_v24 = vld [vmem:[%s2229_s7 + $0x38] sm:$0xff] }
 0xd85   :  { %1511 = vmatmul.msk.f32.vlgmr.msrb.gmra.mxu1 %vm422_vm2, %v1579_v2  ;;  %1218 = vmatpush.msra.mxu2 %v1524_v24 }
 0xd86   :  { %1580 = vpow2.f32 %v1013_v11  ;;  %v1522_v11 = vld [vmem:[%s2229_s7 + $0x28] sm:$0xff] }
 0xd8c   :  { %v1581_v13 = vpop.eup %1580 }
 0xd8d   :  { %1512 = vmatmul.msk.f32.gmra.mxu1 %vm422_vm2, %v1581_v13 }
 0xe02   :  { %v1038_v52 = vpop.f32.mrf.mxu1 }
 0xe03   :  { %v1044_v60 = vmax.f32 %v1038_v52, 1e-30 }
 0xe05   :  { %1582 = vrcp.f32 %v1044_v60  ;;  %v1057_v35 = vand.u32 2147483648, %v1044_v60  ;;  %v1055_v38 = vand.u32 2147483647, %v1044_v60  ;;  %vm1051_vm15 = vweird.f32 %v1044_v60 }
 0xe07   :  { %v1058_v34 = vor.u32 1.1754944e-38, %v1057_v35  ;;  %vm1056_vm6 = vcmp.eq.f32.partialorder %v1055_v38, 8.507059e+37 }
 0xe0a   :  { %v1041_v62 = vpop.f32.mrf.mxu1 }
 0xe0b   :  { %v1583_v43 = vpop.eup %1582  ;;  %v1045_v32 = vmax.f32 %v1041_v62, 1e-30 }
 0xe0c   :  { %v1047_v1 = vmul.f32 %v1583_v43, %v1044_v60  ;;  %vm1052_vm3 = vweird.f32 %v1583_v43 }
 0xe0d   :  { %1584 = vrcp.f32 %v1045_v32  ;;  %vm1053_vm5 = vmor %vm1051_vm15, %vm1052_vm3  ;;  %v1072_v57 = vand.u32 2147483648, %v1045_v32  ;;  %v1070_v39 = vand.u32 2147483647, %v1045_v32  ;;  %vm1066_vm10 = vweird.f32 %v1045_v32 }
 0xe0e   :  { %v1048_v33 = vsub.f32 1.0, %v1047_v1 }
 0xe0f   :  { %v1073_v61 = vor.u32 1.1754944e-38, %v1072_v57  ;;  %vm1071_vm12 = vcmp.eq.f32.partialorder %v1070_v39, 8.507059e+37  ;;  %v1199_v57 = vperm.slane %v2037_v12, 6 }
 0xe10   :  { %v1049_v37 = vmul.f32 %v1583_v43, %v1048_v33 }
 0xe12   :  { %v1050_v47 = vadd.f32 %v1583_v43, %v1049_v37  ;;  %v1191_v37 = vperm.slane %v2037_v12, 3 }
 0xe13   :  { %v1585_v40 = vpop.eup %1584 }
 0xe14   :  { %v1062_v48 = vmul.f32 %v1585_v40, %v1045_v32  ;;  %v1054_v49 = vsel %vm1053_vm5, %v1583_v43, %v1050_v47  ;;  %vm1067_vm9 = vweird.f32 %v1585_v40  ;;  %v1188_v32 = vperm.slane %v2037_v12, 2 }
 0xe15   :  { %v1059_v50 = vsel %vm1056_vm6, %v1058_v34, %v1054_v49  ;;  %vm1068_vm11 = vmor %vm1066_vm10, %vm1067_vm9 }
 0xe16   :  { %v1063_v51 = vsub.f32 1.0, %v1062_v48  ;;  %v1060_v54 = vmul.f32 %v1579_v2, %v1059_v50  ;;  %v1523_v2 = vld [vmem:[%s2229_s7 + $0x30] sm:$0xff] }
 0xe17   :  { %1219 = vmatpush.msra.mxu2 %v1523_v2 }
 0xe18   :  { %1513 = vmatmul.msk.f32.vlgmr.msra.gmra.mxu1 %vm422_vm2, %v1060_v54  ;;  %v1064_v41 = vmul.f32 %v1585_v40, %v1063_v51 }
 0xe19   :  { %1220 = vmatpush.msra.mxu2 %v1522_v11 }
 0xe1a   :  { %v1065_v42 = vadd.f32 %v1585_v40, %v1064_v41 }
 0xe1b   :  { %1221 = vmatpush.msra.mxu2 %v1521_v25 }
 0xe1c   :  { %v1069_v17 = vsel %vm1068_vm11, %v1585_v40, %v1065_v42 }
 0xe1d   :  { %v1074_v27 = vsel %vm1071_vm12, %v1073_v61, %v1069_v17 }
 0xe1e   :  { %v1075_v63 = vmul.f32 %v1581_v13, %v1074_v27 }
 0xe20   :  { %1514 = vmatmul.msk.f32.gmra.mxu1 %vm422_vm2, %v1075_v63  ;;  %v1536_v63 = vld [vmem:[%s2230_s8 + $0x78] sm:$0xff] }
 0xe21   :  { %1340 = vmatpush.msrb.mxu3 %v1536_v63 }
 0xe95   :  { %v1099_v45 = vpop.f32.mrf.mxu1 }
 0xe96   :  { %1519 = vmatmul.msk.f32.vlgmr.msrb.gmra.mxu0 %vm176_vm7, %v1099_v45 }
 0xe9d   :  { %v1102_v0 = vpop.f32.mrf.mxu1 }
 0xe9e   :  { %1520 = vmatmul.msk.f32.gmra.mxu0 %vm176_vm7, %v1102_v0 }
 0xf13   :  { %v1133_v3 = vpop.f32.mrf.mxu0 }
 0xf14   :  { %v1139_v4 = vadd.f32 %v1133_v3, %v2000_v53 }
 0xf16   :  { %v2110_v31 = vadd.f32 %v1141_v46, %v1139_v4 }
 0xf18   :  { %v1144_v5 = vsel %vm176_vm7, %v2110_v31, 0.0 }
 0xf19   :  { %1145 = vadd.xlane.f32.xlu0 %v1144_v5 }
 0xf1b   :  { %v1136_v6 = vpop.f32.mrf.mxu0 }
 0xf1c   :  { %v1140_v8 = vadd.f32 %v1136_v6, %v2005_v59  ;;  %v1534_v6 = vld [vmem:[%s2230_s8 + $0x68] sm:$0xff] }
 0xf1e   :  { %v2115_v9 = vadd.f32 %v1141_v46, %v1140_v8  ;;  %v1535_v46 = vld [vmem:[%s2230_s8 + $0x70] sm:$0xff] }
 0xf1f   :  { %1341 = vmatpush.msrb.mxu3 %v1535_v46 }
 0xf20   :  { %v1147_v10 = vsel %vm180_vm8, %v2115_v9, 0.0 }
 0xf21   :  { %1148 = vadd.xlane.f32.xlu1 %v1147_v10  ;;  %1342 = vmatpush.msrb.mxu3 %v1534_v6 }
 0xf8c   :  { %v1146_v16 = vpop.xlane.xlu0 %1145 }
 0xf8d   :  { %v1150_v36 = vmul.f32 %v1146_v16, %v1732_v55 }
 0xf8f   :  { %v1152_v53 = vsub.f32 %v2110_v31, %v1150_v36  ;;  %v1533_v36 = vld [vmem:[%s2230_s8 + $0x60] sm:$0xff] }
 0xf90   :  { %1343 = vmatpush.msrb.mxu3 %v1533_v36 }
 0xf91   :  { %v1154_v18 = vmul.f32 %v1152_v53, %v1152_v53 }
 0xf93   :  { %v1156_v19 = vsel %vm176_vm7, %v1154_v18, 0.0 }
 0xf94   :  { %1157 = vadd.xlane.f32.xlu2 %v1156_v19  ;;  %v1149_v20 = vpop.xlane.xlu1 %1148 }
 0xf95   :  { %v1151_v21 = vmul.f32 %v1149_v20, %v1732_v55  ;;  %v1532_v20 = vld [vmem:[%s2230_s8 + $0x58] sm:$0xff] }
 0xf96   :  { %1344 = vmatpush.msrb.mxu3 %v1532_v20 }
 0xf97   :  { %v1153_v59 = vsub.f32 %v2115_v9, %v1151_v21 }
 0xf99   :  { %v1155_v22 = vmul.f32 %v1153_v59, %v1153_v59 }
 0xf9b   :  { %v1159_v23 = vsel %vm180_vm8, %v1155_v22, 0.0 }
 0xf9c   :  { %1160 = vadd.xlane.f32.xlu0 %v1159_v23  ;;  %v1531_v23 = vld [vmem:[%s2230_s8 + $0x50] sm:$0xff] }
 0xf9d   :  { %1345 = vmatpush.msrb.mxu3 %v1531_v23 }
0x1007   :  { %v1158_v13 = vpop.xlane.xlu2 %1157 }
0x1008   :  { %v1162_v7 = vmul.f32 %v1158_v13, %v1732_v55  ;;  %v1530_v13 = vld [vmem:[%s2230_s8 + $0x48] sm:$0xff] }
0x1009   :  { %1346 = vmatpush.msrb.mxu3 %v1530_v13 }
0x100a   :  { %v1164_v26 = vadd.f32 1e-05, %v1162_v7 }
0x100c   :  { %1586 = vrsqrt.f32 %v1164_v26  ;;  %vm1172_vm2 = vweird.f32 %v1164_v26 }
0x100f   :  { %v1161_v14 = vpop.xlane.xlu0 %1160 }
0x1010   :  { %v1163_v15 = vmul.f32 %v1161_v14, %v1732_v55 }
0x1012   :  { %v1587_v28 = vpop.eup %1586  ;;  %v1165_v29 = vadd.f32 1e-05, %v1163_v15  ;;  %v1529_v15 = vld [vmem:[%s2230_s8 + $0x40] sm:$0xff] }
0x1013   :  { %v1167_v30 = vmul.f32 %v1587_v28, %v1164_v26  ;;  %vm1173_vm8 = vweird.f32 %v1587_v28  ;;  %1347 = vmatpush.msrb.mxu3 %v1529_v15  ;;  %v1357_v15 = vperm.slane %v2037_v12, 5 }
0x1014   :  { %1588 = vrsqrt.f32 %v1165_v29  ;;  %vm1174_vm13 = vmor %vm1172_vm2, %vm1173_vm8  ;;  %vm1182_vm3 = vweird.f32 %v1165_v29 }
0x1015   :  { %v1168_v56 = vmul.f32 %v1587_v28, %v1167_v30 }
0x1017   :  { %v1169_v52 = vmul.f32 0.5, %v1168_v56 }
0x1019   :  { %v1170_v58 = vsub.f32 1.5, %v1169_v52 }
0x101a   :  { %v1589_v60 = vpop.eup %1588 }
0x101b   :  { %v1171_v62 = vmul.f32 %v1587_v28, %v1170_v58  ;;  %v1177_v43 = vmul.f32 %v1589_v60, %v1165_v29  ;;  %vm1183_vm14 = vweird.f32 %v1589_v60 }
0x101c   :  { %vm1184_vm15 = vmor %vm1182_vm3, %vm1183_vm14 }
0x101d   :  { %v1175_v1 = vsel %vm1174_vm13, %v1587_v28, %v1171_v62  ;;  %v1178_v33 = vmul.f32 %v1589_v60, %v1177_v43 }
0x101e   :  { %v1186_v35 = vmul.f32 %v1175_v1, %v1152_v53 }
0x101f   :  { %v1179_v38 = vmul.f32 0.5, %v1178_v33 }
0x1020   :  { %v1189_v47 = vmul.f32 %v1188_v32, %v1186_v35 }
0x1021   :  { %v1180_v40 = vsub.f32 1.5, %v1179_v38 }
0x1022   :  { %v1192_v34 = vadd.f32 %v1191_v37, %v1189_v47 }
0x1023   :  { %v1181_v48 = vmul.f32 %v1589_v60, %v1180_v40 }
0x1024   :  { %1525 = vmatmul.msk.f32.vlgmr.msra.gmra.mxu2 %vm176_vm7, %v1192_v34 }
0x1025   :  { %v1185_v49 = vsel %vm1184_vm15, %v1589_v60, %v1181_v48 }
0x1026   :  { %v1187_v50 = vmul.f32 %v1185_v49, %v1153_v59 }
0x1028   :  { %v1190_v51 = vmul.f32 %v1188_v32, %v1187_v50 }
0x102a   :  { %v1193_v54 = vadd.f32 %v1191_v37, %v1190_v51 }
0x102c   :  { %1526 = vmatmul.msk.f32.gmra.mxu2 %vm176_vm7, %v1193_v54 }
0x10a7   :  { %v1223_v41 = vpop.f32.mrf.mxu2 }
0x10a8   :  { %v2144_v39 = vadd.f32 %v1223_v41, %v1199_v57 }
0x10aa   :  { %v2147_v42 = vmul.f32 0.70710677, %v2144_v39  ;;  %v1229_v20 = vmul.f32 0.5, %v2144_v39 }
0x10ac   :  { %v1233_v61 = vmul.f32 %v2147_v42, %v2147_v42 }
0x10ae   :  { %v1234_v17 = vmin.f32 %v1233_v61, 16.0 }
0x10af   :  { %v1226_v27 = vpop.f32.mrf.mxu2 }
0x10b0   :  { %v1235_v44 = vmul.f32 2.1237322e-06, %v1234_v17  ;;  %v1246_v45 = vmul.f32 3.8918573e-05, %v1234_v17  ;;  %v2154_v0 = vadd.f32 %v1226_v27, %v1199_v57 }
0x10b2   :  { %v1236_v3 = vadd.f32 0.00028619796, %v1235_v44  ;;  %v1247_v4 = vadd.f32 0.001143296, %v1246_v45  ;;  %v2160_v5 = vmul.f32 0.70710677, %v2154_v0 }
0x10b4   :  { %v1237_v8 = vmul.f32 %v1236_v3, %v1234_v17  ;;  %v1248_v10 = vmul.f32 %v1247_v4, %v1234_v17  ;;  %v1273_v16 = vmul.f32 %v2160_v5, %v2160_v5 }
0x10b6   :  { %v1249_v53 = vadd.f32 0.014752088, %v1248_v10  ;;  %v1238_v18 = vadd.f32 0.0036580483, %v1237_v8  ;;  %v1274_v19 = vmin.f32 %v1273_v16, 16.0 }
0x10b8   :  { %v1250_v21 = vmul.f32 %v1249_v53, %v1234_v17  ;;  %v1275_v59 = vmul.f32 2.1237322e-06, %v1274_v19  ;;  %v1286_v22 = vmul.f32 3.8918573e-05, %v1274_v19  ;;  %v1239_v2 = vmul.f32 %v1238_v18, %v1234_v17 }
0x10ba   :  { %v1251_v24 = vadd.f32 0.112945676, %v1250_v21  ;;  %v1276_v11 = vadd.f32 0.00028619796, %v1275_v59  ;;  %v1287_v25 = vadd.f32 0.001143296, %v1286_v22 }
0x10bb   :  { %v1240_v29 = vadd.f32 0.05243302, %v1239_v2 }
0x10bc   :  { %v1252_v7 = vmul.f32 %v1251_v24, %v1234_v17  ;;  %v1277_v26 = vmul.f32 %v1276_v11, %v1274_v19  ;;  %v1288_v14 = vmul.f32 %v1287_v25, %v1274_v19  ;;  %v1230_v25 = vmul.f32 0.5, %v2154_v0  ;;  %v63_v0 = vld [vmem:[%s2232_s10 + $0x60] sm:$0xff] }
0x10bd   :  { %v1241_v62 = vmul.f32 %v1240_v29, %v1234_v17 }
0x10be   :  { %v1253_v28 = vadd.f32 0.4994258, %v1252_v7  ;;  %v1289_v30 = vadd.f32 0.014752088, %v1288_v14  ;;  %v1278_v52 = vadd.f32 0.0036580483, %v1277_v26 }
0x10bf   :  { %v1242_v33 = vadd.f32 0.18741608, %v1241_v62  ;;  %v1388_v62 = vld [vmem:[%s2231_s9 + $0x10] sm:$0xff] }
0x10c0   :  { %v1254_v56 = vmul.f32 %v1253_v28, %v1234_v17  ;;  %v1290_v58 = vmul.f32 %v1289_v30, %v1274_v19  ;;  %v1279_v32 = vmul.f32 %v1278_v52, %v1274_v19 }
0x10c1   :  { %v1243_v40 = vmul.f32 %v1242_v33, %v1234_v17 }
0x10c2   :  { %v1255_v60 = vadd.f32 1.0, %v1254_v56  ;;  %v1291_v43 = vadd.f32 0.112945676, %v1290_v58  ;;  %v1280_v37 = vadd.f32 0.05243302, %v1279_v32  ;;  %v1386_v32 = vld [vmem:[%s2231_s9] sm:$0xff] }
0x10c3   :  { %v1244_v54 = vadd.f32 1.1283791, %v1243_v40 }
0x10c4   :  { %1590 = vrcp.f32 %v1255_v60  ;;  %v1292_v1 = vmul.f32 %v1291_v43, %v1274_v19  ;;  %v1281_v49 = vmul.f32 %v1280_v37, %v1274_v19  ;;  %v1267_v51 = vand.u32 2147483648, %v1255_v60  ;;  %v1387_v43 = vld [vmem:[%s2231_s9 + $0x8] sm:$0xff] }
0x10c5   :  { %v1265_v41 = vand.u32 2147483647, %v1255_v60  ;;  %vm1261_vm6 = vweird.f32 %v1255_v60  ;;  %v1245_v45 = vmul.f32 %v1244_v54, %v2147_v42 }
0x10c6   :  { %v1293_v35 = vadd.f32 0.4994258, %v1292_v1  ;;  %v1282_v61 = vadd.f32 0.18741608, %v1281_v49  ;;  %v1268_v63 = vor.u32 1.1754944e-38, %v1267_v51  ;;  %v1596_v49 = vld [vmem:[%s2225_s3 + $0x8] sm:$0xff] }
0x10c7   :  { %vm1266_vm10 = vcmp.eq.f32.partialorder %v1265_v41, 8.507059e+37  ;;  %v1415_v54 = vperm.slane %v1596_v49, 3 }
0x10c8   :  { %v1294_v38 = vmul.f32 %v1293_v35, %v1274_v19  ;;  %v1283_v3 = vmul.f32 %v1282_v61, %v1274_v19  ;;  %v1547_v61 = vld [vmem:[%s2231_s9 + $0x20] ss:$0 sm:$0xff] }
0x10ca   :  { %v1591_v47 = vpop.eup %1590  ;;  %v1295_v48 = vadd.f32 1.0, %v1294_v38  ;;  %v1284_v36 = vadd.f32 1.1283791, %v1283_v3 }
0x10cb   :  { %v1257_v34 = vmul.f32 %v1591_v47, %v1255_v60  ;;  %vm1262_vm5 = vweird.f32 %v1591_v47  ;;  %v1389_v60 = vld [vmem:[%s2231_s9 + $0x18] sm:$0xff] }
0x10cc   :  { %1592 = vrcp.f32 %v1295_v48  ;;  %vm1263_vm9 = vmor %vm1261_vm6, %vm1262_vm5  ;;  %v1307_v16 = vand.u32 2147483648, %v1295_v48  ;;  %v1305_v18 = vand.u32 2147483647, %v1295_v48  ;;  %vm1301_vm12 = vweird.f32 %v1295_v48  ;;  %1433 = vmatpush.msra.mxu0 %v1389_v60 }
0x10cd   :  { %v1258_v50 = vsub.f32 1.0, %v1257_v34  ;;  %v1285_v23 = vmul.f32 %v1284_v36, %v2160_v5 }
0x10ce   :  { %v1308_v42 = vor.u32 1.1754944e-38, %v1307_v16  ;;  %vm1306_vm2 = vcmp.eq.f32.partialorder %v1305_v18, 8.507059e+37  ;;  %1434 = vmatpush.msra.mxu0 %v1388_v62 }
0x10cf   :  { %v1259_v57 = vmul.f32 %v1591_v47, %v1258_v50  ;;  %v1413_v50 = vperm.slane %v1596_v49, 2 }
0x10d0   :  { %1435 = vmatpush.msra.mxu0 %v1387_v43 }
0x10d1   :  { %v1260_v27 = vadd.f32 %v1591_v47, %v1259_v57 }
0x10d2   :  { %v1593_v44 = vpop.eup %1592  ;;  %1436 = vmatpush.msra.mxu0 %v1386_v32 }
0x10d3   :  { %v1264_v46 = vsel %vm1263_vm9, %v1591_v47, %v1260_v27  ;;  %v1297_v4 = vmul.f32 %v1593_v44, %v1295_v48  ;;  %vm1302_vm11 = vweird.f32 %v1593_v44 }
0x10d4   :  { %v1269_v17 = vsel %vm1266_vm10, %v1268_v63, %v1264_v46  ;;  %vm1303_vm8 = vmor %vm1301_vm12, %vm1302_vm11 }
0x10d5   :  { %v1270_v6 = vmul.f32 %v1269_v17, %v1245_v45  ;;  %v1298_v8 = vsub.f32 1.0, %v1297_v4 }
0x10d7   :  { %v1527_v10 = vclamps-f32 %v1270_v6, 1.0  ;;  %v1299_v53 = vmul.f32 %v1593_v44, %v1298_v8 }
0x10d9   :  { %v1313_v21 = vadd.f32 1.0, %v1527_v10  ;;  %v1300_v59 = vadd.f32 %v1593_v44, %v1299_v53 }
0x10db   :  { %v1315_v22 = vmul.f32 %v1313_v21, %v1229_v20  ;;  %v1304_v19 = vsel %vm1303_vm8, %v1593_v44, %v1300_v59 }
0x10dc   :  { %v1309_v24 = vsel %vm1306_vm2, %v1308_v42, %v1304_v19 }
0x10dd   :  { %1537 = vmatmul.msk.f32.vlgmr.msrb.gmra.mxu3 %vm744_vm4, %v1315_v22  ;;  %v1310_v2 = vmul.f32 %v1309_v24, %v1285_v23 }
0x10df   :  { %v1528_v11 = vclamps-f32 %v1310_v2, 1.0 }
0x10e1   :  { %v1314_v13 = vadd.f32 1.0, %v1528_v11 }
0x10e3   :  { %v1316_v7 = vmul.f32 %v1314_v13, %v1230_v25 }
0x10e5   :  { %1538 = vmatmul.msk.f32.gmra.mxu3 %vm744_vm4, %v1316_v7 }
0x1160   :  { %v1349_v39 = vpop.f32.mrf.mxu3 }
0x1161   :  { %v1355_v14 = vadd.f32 %v1349_v39, %v2110_v31 }
0x1163   :  { %v1358_v29 = vadd.f32 %v1357_v15, %v1355_v14 }
0x1168   :  { %v1352_v26 = vpop.f32.mrf.mxu3 }
0x1169   :  { %v1356_v5 = vadd.f32 %v1352_v26, %v2115_v9 }
0x116b   :  { %v1359_v28 = vadd.f32 %v1357_v15, %v1356_v5 }
0x116d   :  { %1539 = vmatpush.msk.msrb.mxu1 %vm291_vm0, %v1359_v28 }
0x116f   :  { %1381 = vmatpush.msrb.mxu1 %v1358_v29 }
0x1170   :  { %1540 = vmatmul.msk.f32.vlgmr.msrb.gmra.mxu1 %vm275_vm1, %v63_v0 }
0x11ed   :  { %v1383_v30 = vpop.f32.mrf.mxu1 }
0x11ee   :  { %v1391_v56 = vsel %vm176_vm7, %v1383_v30, 0.0 }
0x11ef   :  { %1392 = vadd.xlane.f32.xlu1 %v1391_v56 }
0x1262   :  { %v1393_v31 = vpop.xlane.xlu1 %1392 }
0x1263   :  { %v1394_v12 = vmul.f32 %v1393_v31, %v1732_v55 }
0x1265   :  { %v1395_v52 = vsub.f32 %v1383_v30, %v1394_v12 }
0x1267   :  { %v1396_v9 = vmul.f32 %v1395_v52, %v1395_v52 }
0x1269   :  { %v1397_v58 = vsel %vm176_vm7, %v1396_v9, 0.0 }
0x126a   :  { %1398 = vadd.xlane.f32.xlu2 %v1397_v58 }
0x12dd   :  { %v1399_v1 = vpop.xlane.xlu2 %1398 }
0x12de   :  { %v1400_v33 = vmul.f32 %v1399_v1, %v1732_v55 }
0x12e0   :  { %v1401_v35 = vadd.f32 1e-05, %v1400_v33 }
0x12e2   :  { %1594 = vrsqrt.f32 %v1401_v35  ;;  %vm1408_vm1 = vweird.f32 %v1401_v35 }
0x12e8   :  { %v1595_v37 = vpop.eup %1594 }
0x12e9   :  { %v1403_v38 = vmul.f32 %v1595_v37, %v1401_v35  ;;  %vm1409_vm0 = vweird.f32 %v1595_v37 }
0x12ea   :  { %vm1410_vm4 = vmor %vm1408_vm1, %vm1409_vm0 }
0x12eb   :  { %v1404_v47 = vmul.f32 %v1595_v37, %v1403_v38 }
0x12ed   :  { %v1405_v40 = vmul.f32 0.5, %v1404_v47 }
0x12ef   :  { %v1406_v34 = vsub.f32 1.5, %v1405_v40 }
0x12f1   :  { %v1407_v48 = vmul.f32 %v1595_v37, %v1406_v34 }
0x12f3   :  { %v1411_v51 = vsel %vm1410_vm4, %v1595_v37, %v1407_v48 }
0x12f4   :  { %v1412_v57 = vmul.f32 %v1411_v51, %v1395_v52 }
0x12f6   :  { %v1414_v55 = vmul.f32 %v1413_v50, %v1412_v57 }
0x12f8   :  { %v1416_v41 = vadd.f32 %v1415_v54, %v1414_v55 }
0x12fa   :  { %1541 = vmatmul.msk.f32.vlgmr.msra.gmra.mxu0 %vm176_vm7, %v1416_v41 }
0x1377   :  { %v1438_v27 = vpop.f32.mrf.mxu0 }
0x1378   :  { %v1439_v63 = vadd.f32 %v1547_v61, %v1438_v27 }
0x137a   :  { %1441 = vst [vmem:[%s2233_s11] sm:$0xff] %v1439_v63 }
0x137b   :  { %1446 = vsyncpa [#allocation3], 1 }

</bundles_post_ra>
